<compile_context>
chip_gen: v6e
topology: v6e:2x2x1
jax: 0.10.0
libtpu: 0.0.40
codegen_flags: <defaults>
</compile_context>

<pallas_src>
from functools import partial

import jax
import jax.numpy as jnp
from jax.experimental import pallas as pl
from jax.experimental.pallas import tpu as pltpu


# ----------------------------------------------------------------------------
# Fused kernel.
# ----------------------------------------------------------------------------
def motion_encoder_kernel(
    x_ref,       # (F*B, in_dim) f32   masked input, frame-major rows (t*B + b)
    init_ref,    # (B, 88)       f32
    w_ref,       # (rows, ncol)  bf16  packed weight slab (static offsets)
    b_ref,       # (8, ncol)     f32   packed bias slab (+ gate-scale row)
    out_ref,     # (B, F, H+J3)  f32   motion_context layout [ctx | pred_kp3d]
    gin_scr,     # (F, B, 4H)    f32   VMEM scratch: hoisted layer-0 gate input
    *, F, B, H, L, J3, IN, offs,
):
    f32, bf16 = jnp.float32, jnp.bfloat16
    H4 = 4 * H

    def wblk(name, r, c):          # static slice of the bf16 weight slab
        o = offs[name]
        return w_ref[o:o + r, :c]

    def brow(i, c):                # static (1, c) row of the f32 bias slab
        return b_ref[i:i + 1, :c]

    ROW_N1B, ROW_N2B, ROW_N3B, ROW_BA0, ROW_BFB = 0, 1, 2, 3, 4
    ROW_BAREST0 = 5
    ROW_BDEC = 5 + (L - 1)
    ROW_GSCALE = 6 + (L - 1)

    # ---------------- NeuralInitialization MLP -> (h0, c0) -----------------
    z = init_ref[...].astype(bf16)                                    # (B, 88)
    h1 = jnp.maximum(
        jnp.dot(z, wblk("n1w", 88, H), preferred_element_type=f32)
        + brow(ROW_N1B, H), 0.0)
    h2 = jnp.maximum(
        jnp.dot(h1.astype(bf16), wblk("n2w", H, L * H), preferred_element_type=f32)
        + brow(ROW_N2B, L * H), 0.0)
    hc = (jnp.dot(h2.astype(bf16), wblk("n3w", L * H, 2 * L * H),
                  preferred_element_type=f32) + brow(ROW_N3B, 2 * L * H))
    # flat layout = [h(layer 0..L-1), c(layer 0..L-1)]
    h_state = [hc[:, l * H:(l + 1) * H] for l in range(L)]
    c_state = [hc[:, (L + l) * H:(L + l + 1) * H] for l in range(L)]

    # -------- hoisted layer-0 input projection (embed layer folded) --------
    gin = (jnp.dot(x_ref[...].astype(bf16), wblk("win0", IN, H4),
                   preferred_element_type=f32) + brow(ROW_BA0, H4))   # (F*B, 4H)
    for t in range(F):                       # prologue relayout, off the chain
        gin_scr[t] = gin[t * B:(t + 1) * B, :]

    # -------- hoist weight/bias slab reads out of the frame loop -----------
    wr0i = wblk("wr0i", J3 + H, H4)          # [Wp0 ; Wh0]         frame 0
    wr0f = wblk("wr0f", 2 * H, H4)           # [Wdec^T@Wp0 ; Wh0]  frames >= 1
    wrr = [wblk("wrr%d" % l, 2 * H, H4) for l in range(1, L)]
    barest = [brow(ROW_BAREST0 + (l - 1), H4) for l in range(1, L)]
    bfb = brow(ROW_BFB, H4)
    gscale = brow(ROW_GSCALE, H4)            # 0.5 for i/f/o cols, 1.0 for g cols
    init_kp = init_ref[:, :J3]               # pred_list[0] = init[..., :J3]

    def lstm_cell(g, c_prev):
        # one full-width EUP tanh: sigmoid(x) = 0.5 + 0.5 * tanh(0.5 * x)
        th = jnp.tanh(g * gscale)
        sg = 0.5 * th + 0.5
        c_new = sg[:, H:2 * H] * c_prev + sg[:, :H] * th[:, 2 * H:3 * H]
        h_new = sg[:, 3 * H:] * jnp.tanh(c_new)
        return h_new, c_new

    # --------------------- autoregressive frame loop -----------------------
    h_top = None
    for t in range(F):                       # F is small & static -> unrolled
        gin_t = gin_scr[t]                   # (B, 4H) clean leading-axis read
        if t == 0:
            rec = jnp.concatenate([init_kp, h_state[0]], axis=-1)    # (B, J3+H)
            g = gin_t + jnp.dot(rec.astype(bf16), wr0i, preferred_element_type=f32)
        else:
            # decoder folded: feedback enters directly from h_top_{t-1}
            rec = jnp.concatenate([h_top, h_state[0]], axis=-1)      # (B, 2H)
            g = gin_t + jnp.dot(rec.astype(bf16), wr0f,
                                preferred_element_type=f32) + bfb
        h_state[0], c_state[0] = lstm_cell(g, c_state[0])

        for l in range(1, L):                # inter-layer dropout = identity
            rec = jnp.concatenate([h_state[l - 1], h_state[l]], axis=-1)
            g = (jnp.dot(rec.astype(bf16), wrr[l - 1],
                         preferred_element_type=f32) + barest[l - 1])
            h_state[l], c_state[l] = lstm_cell(g, c_state[l])

        h_top = h_state[L - 1]
        out_ref[:, t:t + 1, :H] = h_top[:, None, :]   # direct final-layout store

    # ------------- batched decoder epilogue (off the chain) ----------------
    wdec = wblk("wdec", H, J3)
    bdec = brow(ROW_BDEC, J3)
    for b in range(B):
        ctx_b = out_ref[b, :, :H]                                     # (F, H)
        out_ref[b, :, H:] = (jnp.dot(ctx_b.astype(bf16), wdec,
                                     preferred_element_type=f32) + bdec)


# ----------------------------------------------------------------------------
# One-time weight preparation: folding, packing into 2 slabs, static offsets.
# ----------------------------------------------------------------------------
def prepare_params(params, *, d_embed, n_layers, n_joints):
    H, L, J3 = d_embed, n_layers, 3 * n_joints
    H4 = 4 * H
    hi = jax.lax.Precision.HIGHEST
    f32 = jnp.float32

    w_ih0, w_hh0, b_ih0, b_hh0 = params["lstm"][0]
    wx0 = w_ih0[:, :H].T                     # (H, 4H)   embedded-input columns
    wp0 = w_ih0[:, H:H + J3].T               # (J3, 4H)  feedback columns
    wh0 = w_hh0.T                            # (H, 4H)

    win0 = jnp.dot(params["we"].T, wx0, precision=hi)                 # embed fold
    ba0 = b_ih0 + b_hh0 + jnp.dot(params["be"], wx0, precision=hi)
    wdec_t = params["wdec"].T                                         # (H, J3)
    wfb = jnp.dot(wdec_t, wp0, precision=hi)                          # decoder fold
    bfb = jnp.dot(params["bdec"], wp0, precision=hi)

    blocks = [
        ("n1w", params["n1w"].T),                            # (88, H)
        ("n2w", params["n2w"].T),                            # (H, L*H)
        ("n3w", params["n3w"].T),                            # (L*H, 2*L*H)
        ("win0", win0),                                      # (in_dim, 4H)
        ("wr0i", jnp.concatenate([wp0, wh0], axis=0)),       # (J3+H, 4H)
        ("wr0f", jnp.concatenate([wfb, wh0], axis=0)),       # (2H, 4H)
    ]
    for l in range(1, L):
        w_ih, w_hh, _, _ = params["lstm"][l]
        blocks.append(("wrr%d" % l, jnp.concatenate([w_ih.T, w_hh.T], axis=0)))
    blocks.append(("wdec", wdec_t))                          # (H, J3)

    ncol = max(128, H4, 2 * L * H)
    ncol = -(-ncol // 128) * 128
    offs, rows, padded = {}, 0, []
    for name, a in blocks:
        offs[name] = rows
        r = -(-a.shape[0] // 16) * 16        # 16-row align (bf16 sublane packing)
        padded.append(jnp.pad(a.astype(f32),
                              ((0, r - a.shape[0]), (0, ncol - a.shape[1]))))
        rows += r
    wslab = jnp.concatenate(padded, axis=0).astype(jnp.bfloat16)

    gscale = jnp.concatenate([jnp.full((H,), 0.5), jnp.full((H,), 0.5),
                              jnp.ones((H,)), jnp.full((H,), 0.5)]).astype(f32)
    brows = [params["n1b"], params["n2b"], params["n3b"], ba0, bfb]
    for l in range(1, L):
        _, _, b_ih, b_hh = params["lstm"][l]
        brows.append(b_ih + b_hh)
    brows.append(params["bdec"])
    brows.append(gscale)
    nb = -(-len(brows) // 8) * 8
    rows_b = [jnp.pad(b.astype(f32), (0, ncol - b.shape[0])) for b in brows]
    rows_b += [jnp.zeros((ncol,), f32)] * (nb - len(rows_b))
    bslab = jnp.stack(rows_b, axis=0)

    return wslab, bslab, offs


# ----------------------------------------------------------------------------
# Per-call wrapper: masking + one pallas_call; weights are pre-packed slabs.
# ----------------------------------------------------------------------------
def motion_encoder_forward(wslab, bslab, x, init, mask,
                           *, d_embed, n_layers, n_joints, offs):
    B, F = x.shape[:2]
    H, L, J = d_embed, n_layers, n_joints
    J3 = 3 * J
    in_dim = x.shape[-1]

    # zero masked 2-D keypoints (self_mask_embedding is a zeros Parameter -> no-op)
    kp = jnp.where(jnp.repeat(mask, 2, axis=-1), 0.0, x[..., :2 * J])
    xm = jnp.concatenate([kp, x[..., 2 * J:]], axis=-1)               # (B, F, in)
    x_seq = xm.transpose(1, 0, 2).reshape(F * B, in_dim)              # frame-major
    init2d = init.reshape(B, 88)

    out = pl.pallas_call(
        partial(motion_encoder_kernel,
                F=F, B=B, H=H, L=L, J3=J3, IN=in_dim, offs=offs),
        out_shape=jax.ShapeDtypeStruct((B, F, H + J3), jnp.float32),
        scratch_shapes=[pltpu.VMEM((F, B, 4 * H), jnp.float32)],
    )(x_seq, init2d, wslab, bslab)

    pred_kp3d = out[..., H:].reshape(B, F, J, 3)
    motion_context = out                     # already [ctx | pred_kp3d] layout
    return pred_kp3d, motion_context


# ----------------------------------------------------------------------------
# Parameters matching the PyTorch module's initializers (eval-mode forward).
# ----------------------------------------------------------------------------
def init_params(key, in_dim, d_embed, n_layers, n_joints):
    H, L, J3 = d_embed, n_layers, n_joints * 3
    ks = iter(jax.random.split(key, 16))

    def lin(k, fan_in, fan_out):
        s = 1.0 / (fan_in ** 0.5)
        kw, kb = jax.random.split(k)
        w = jax.random.uniform(kw, (fan_out, fan_in), jnp.float32, -s, s)
        b = jax.random.uniform(kb, (fan_out,), jnp.float32, -s, s)
        return w, b

    p = {}
    p["we"], p["be"] = lin(next(ks), in_dim, H)            # embed_layer
    p["n1w"], p["n1b"] = lin(next(ks), 88, H)              # NeuralInitialization
    p["n2w"], p["n2b"] = lin(next(ks), H, H * L)
    p["n3w"], p["n3b"] = lin(next(ks), H * L, 2 * L * H)
    p["lstm"] = []
    for l in range(L):
        in_l = (H + J3) if l == 0 else H
        s = 1.0 / (H ** 0.5)
        kw1, kw2, kb1, kb2 = jax.random.split(next(ks), 4)
        p["lstm"].append((
            jax.random.uniform(kw1, (4 * H, in_l), jnp.float32, -s, s),   # W_ih
            jax.random.uniform(kw2, (4 * H, H), jnp.float32, -s, s),      # W_hh
            jax.random.uniform(kb1, (4 * H,), jnp.float32, -s, s),        # b_ih
            jax.random.uniform(kb2, (4 * H,), jnp.float32, -s, s),        # b_hh
        ))
    # declayer0: xavier_uniform(gain=0.01) weight, default Linear bias init
    bound = 0.01 * (6.0 / (H + J3)) ** 0.5
    kdw, kdb = jax.random.split(next(ks))
    p["wdec"] = jax.random.uniform(kdw, (J3, H), jnp.float32, -bound, bound)
    sd = 1.0 / (H ** 0.5)
    p["bdec"] = jax.random.uniform(kdb, (J3,), jnp.float32, -sd, sd)
    return p


# ----------------------------------------------------------------------------
# Pure-JAX reference (mirrors the PyTorch forward step by step) for validation.
# ----------------------------------------------------------------------------
def motion_encoder_ref(params, x, init, mask, *, d_embed, n_layers, n_joints):
    B, F = x.shape[:2]
    H, L, J = d_embed, n_layers, n_joints
    J3 = 3 * J
    kp = jnp.where(jnp.repeat(mask, 2, axis=-1), 0.0, x[..., :2 * J])
    xm = jnp.concatenate([kp, x[..., 2 * J:]], axis=-1)
    emb = xm @ params["we"].T + params["be"]                     # (B, F, H)

    z = init.reshape(B, 88)
    h = jax.nn.relu(z @ params["n1w"].T + params["n1b"])
    h = jax.nn.relu(h @ params["n2w"].T + params["n2b"])
    hc = (h @ params["n3w"].T + params["n3b"]).reshape(B, 2, L, H).transpose(1, 2, 0, 3)
    h_st = [hc[0, l] for l in range(L)]
    c_st = [hc[1, l] for l in range(L)]

    prev = z[:, :J3]
    preds, ctxs = [], []
    for t in range(F):
        inp = jnp.concatenate([emb[:, t], prev], axis=-1)
        for l in range(L):
            w_ih, w_hh, b_ih, b_hh = params["lstm"][l]
            g = inp @ w_ih.T + h_st[l] @ w_hh.T + b_ih + b_hh
            i = jax.nn.sigmoid(g[:, :H]); f = jax.nn.sigmoid(g[:, H:2 * H])
            gg = jnp.tanh(g[:, 2 * H:3 * H]); o = jax.nn.sigmoid(g[:, 3 * H:4 * H])
            c_st[l] = f * c_st[l] + i * gg
            h_st[l] = o * jnp.tanh(c_st[l])
            inp = h_st[l]
        pred = h_st[L - 1] @ params["wdec"].T + params["bdec"]
        prev = pred
        preds.append(pred); ctxs.append(h_st[L - 1])
    pred_kp3d = jnp.stack(preds, axis=1).reshape(B, F, J, 3)
    motion_context = jnp.concatenate(
        [jnp.stack(ctxs, axis=1), pred_kp3d.reshape(B, F, J3)], axis=-1)
    return pred_kp3d, motion_context


# ----------------------------------------------------------------------------
if __name__ == "__main__":
    # Small shapes: B=2, F=8, n_joints=4 -> in_dim = 2*4+3 = 11, d_embed=32, L=2
    B, F, J = 2, 8, 4
    D_EMBED, N_LAYERS = 32, 2
    IN_DIM = 2 * J + 3

    key = jax.random.PRNGKey(0)
    kx, ki, km, kp = jax.random.split(key, 4)
    x = jax.random.normal(kx, (B, F, IN_DIM), jnp.float32)
    init = jax.random.normal(ki, (B, 1, 88), jnp.float32)
    mask = jax.random.bernoulli(km, 0.2, (B, F, J))

    params = init_params(kp, IN_DIM, D_EMBED, N_LAYERS, J)
    # one-time weight folding / slab packing (NOT re-run per forward call)
    wslab, bslab, offs = prepare_params(
        params, d_embed=D_EMBED, n_layers=N_LAYERS, n_joints=J)

    fwd = jax.jit(partial(motion_encoder_forward,
                          d_embed=D_EMBED, n_layers=N_LAYERS, n_joints=J,
                          offs=offs))
    pred_kp3d, motion_context = fwd(wslab, bslab, x, init, mask)
    jax.block_until_ready((pred_kp3d, motion_context))

    assert pred_kp3d.shape == (B, F, J, 3)
    assert motion_context.shape == (B, F, D_EMBED + J * 3)

    # Correctness vs a step-by-step pure-JAX reference.  Tolerance accounts for
    # the exact algebraic folds (embed & decoder) plus bf16 MXU operands with
    # f32 accumulation / f32 state (expected drift ~1e-3 over F=8 frames).
    ref_pred, ref_ctx = motion_encoder_ref(
        params, x, init, mask, d_embed=D_EMBED, n_layers=N_LAYERS, n_joints=J)
    assert bool(jnp.allclose(motion_context, ref_ctx, atol=2e-2, rtol=0.0)), \
        float(jnp.max(jnp.abs(motion_context - ref_ctx)))
    assert bool(jnp.allclose(pred_kp3d, ref_pred, atol=2e-2, rtol=0.0)), \
        float(jnp.max(jnp.abs(pred_kp3d - ref_pred)))

    print("KERNEL_OK")
</pallas_src>

<mosaic_0001>
module attributes {stable_mosaic.version = 11 : i64} {
  func.func @motion_encoder_kernel(%arg0: memref<16x11xf32, #tpu.memory_space<vmem>>, %arg1: memref<2x88xf32, #tpu.memory_space<vmem>>, %arg2: memref<416x128xbf16, #tpu.memory_space<vmem>>, %arg3: memref<8x128xf32, #tpu.memory_space<vmem>>, %arg4: memref<2x8x44xf32, #tpu.memory_space<vmem>>, %arg5: memref<8x2x128xf32, #tpu.memory_space<vmem>>) attributes {dimension_semantics = [], scalar_prefetch = 0 : i64, scratch_operands = 1 : i64, tpu.core_type = #tpu.core_type<tc>} {
    %c0 = arith.constant 0 : index
    %c0_0 = arith.constant 0 : index
    %0 = vector.load %arg1[%c0, %c0_0] : memref<2x88xf32, #tpu.memory_space<vmem>>, vector<2x88xf32>
    %1 = arith.truncf %0 : vector<2x88xf32> to vector<2x88xbf16>
    %c0_1 = arith.constant 0 : index
    %c0_2 = arith.constant 0 : index
    %2 = vector.load %arg2[%c0_1, %c0_2] : memref<416x128xbf16, #tpu.memory_space<vmem>>, vector<88x32xbf16>
    %cst = arith.constant dense<0.000000e+00> : vector<2x32xf32>
    %3 = tpu.matmul %1, %2, %cst {dimension_numbers = #tpu.dot_dimension_numbers<[1], [0], [0], [1], [0, 0, 1, 1], [], []>} : vector<2x88xbf16>, vector<88x32xbf16>, vector<2x32xf32> -> vector<2x32xf32>
    %c0_3 = arith.constant 0 : index
    %c0_4 = arith.constant 0 : index
    %4 = vector.load %arg3[%c0_3, %c0_4] : memref<8x128xf32, #tpu.memory_space<vmem>>, vector<1x32xf32>
    %5 = vector.broadcast %4 : vector<1x32xf32> to vector<2x32xf32>
    %6 = arith.addf %3, %5 : vector<2x32xf32>
    %cst_5 = arith.constant 0.000000e+00 : f32
    %7 = vector.broadcast %cst_5 : f32 to vector<2x32xf32>
    %8 = arith.maximumf %6, %7 : vector<2x32xf32>
    %9 = arith.truncf %8 : vector<2x32xf32> to vector<2x32xbf16>
    %c96 = arith.constant 96 : index
    %c0_6 = arith.constant 0 : index
    %10 = vector.load %arg2[%c96, %c0_6] : memref<416x128xbf16, #tpu.memory_space<vmem>>, vector<32x64xbf16>
    %cst_7 = arith.constant dense<0.000000e+00> : vector<2x64xf32>
    %11 = tpu.matmul %9, %10, %cst_7 {dimension_numbers = #tpu.dot_dimension_numbers<[1], [0], [0], [1], [0, 0, 1, 1], [], []>} : vector<2x32xbf16>, vector<32x64xbf16>, vector<2x64xf32> -> vector<2x64xf32>
    %c1 = arith.constant 1 : index
    %c0_8 = arith.constant 0 : index
    %12 = vector.load %arg3[%c1, %c0_8] : memref<8x128xf32, #tpu.memory_space<vmem>>, vector<1x64xf32>
    %13 = vector.broadcast %12 : vector<1x64xf32> to vector<2x64xf32>
    %14 = arith.addf %11, %13 : vector<2x64xf32>
    %cst_9 = arith.constant 0.000000e+00 : f32
    %15 = vector.broadcast %cst_9 : f32 to vector<2x64xf32>
    %16 = arith.maximumf %14, %15 : vector<2x64xf32>
    %17 = arith.truncf %16 : vector<2x64xf32> to vector<2x64xbf16>
    %c128 = arith.constant 128 : index
    %c0_10 = arith.constant 0 : index
    %18 = vector.load %arg2[%c128, %c0_10] : memref<416x128xbf16, #tpu.memory_space<vmem>>, vector<64x128xbf16>
    %cst_11 = arith.constant dense<0.000000e+00> : vector<2x128xf32>
    %19 = tpu.matmul %17, %18, %cst_11 {dimension_numbers = #tpu.dot_dimension_numbers<[1], [0], [0], [1], [0, 0, 1, 1], [], []>} : vector<2x64xbf16>, vector<64x128xbf16>, vector<2x128xf32> -> vector<2x128xf32>
    %c2 = arith.constant 2 : index
    %c0_12 = arith.constant 0 : index
    %20 = vector.load %arg3[%c2, %c0_12] : memref<8x128xf32, #tpu.memory_space<vmem>>, vector<1x128xf32>
    %21 = vector.broadcast %20 : vector<1x128xf32> to vector<2x128xf32>
    %22 = arith.addf %19, %21 : vector<2x128xf32>
    %23 = vector.extract_strided_slice %22 {offsets = [0, 0], sizes = [2, 32], strides = [1, 1]} : vector<2x128xf32> to vector<2x32xf32>
    %24 = vector.extract_strided_slice %22 {offsets = [0, 32], sizes = [2, 32], strides = [1, 1]} : vector<2x128xf32> to vector<2x32xf32>
    %25 = vector.extract_strided_slice %22 {offsets = [0, 64], sizes = [2, 32], strides = [1, 1]} : vector<2x128xf32> to vector<2x32xf32>
    %26 = vector.extract_strided_slice %22 {offsets = [0, 96], sizes = [2, 32], strides = [1, 1]} : vector<2x128xf32> to vector<2x32xf32>
    %c0_13 = arith.constant 0 : index
    %c0_14 = arith.constant 0 : index
    %27 = vector.load %arg0[%c0_13, %c0_14] : memref<16x11xf32, #tpu.memory_space<vmem>>, vector<16x11xf32>
    %28 = arith.truncf %27 : vector<16x11xf32> to vector<16x11xbf16>
    %c192 = arith.constant 192 : index
    %c0_15 = arith.constant 0 : index
    %29 = vector.load %arg2[%c192, %c0_15] : memref<416x128xbf16, #tpu.memory_space<vmem>>, vector<11x128xbf16>
    %cst_16 = arith.constant dense<0.000000e+00> : vector<16x128xf32>
    %30 = tpu.matmul %28, %29, %cst_16 {dimension_numbers = #tpu.dot_dimension_numbers<[1], [0], [0], [1], [0, 0, 1, 1], [], []>} : vector<16x11xbf16>, vector<11x128xbf16>, vector<16x128xf32> -> vector<16x128xf32>
    %c3 = arith.constant 3 : index
    %c0_17 = arith.constant 0 : index
    %31 = vector.load %arg3[%c3, %c0_17] : memref<8x128xf32, #tpu.memory_space<vmem>>, vector<1x128xf32>
    %32 = vector.broadcast %31 : vector<1x128xf32> to vector<16x128xf32>
    %33 = arith.addf %30, %32 : vector<16x128xf32>
    %34 = vector.extract_strided_slice %33 {offsets = [0, 0], sizes = [2, 128], strides = [1, 1]} : vector<16x128xf32> to vector<2x128xf32>
    %c0_18 = arith.constant 0 : index
    %c0_19 = arith.constant 0 : index
    %c0_20 = arith.constant 0 : index
    %35 = vector.load %arg5[%c0_18, %c0_19, %c0_20] : memref<8x2x128xf32, #tpu.memory_space<vmem>>, vector<1x2x128xf32>
    %36 = vector.shape_cast %35 : vector<1x2x128xf32> to vector<2x128xf32>
    %37 = vector.shape_cast %34 : vector<2x128xf32> to vector<1x2x128xf32>
    tpu.vector_store %arg5[%c0_18, %c0_19, %c0_20], %37 {strides = array<i32>} : memref<8x2x128xf32, #tpu.memory_space<vmem>>, vector<1x2x128xf32>,
    %38 = vector.extract_strided_slice %33 {offsets = [2, 0], sizes = [2, 128], strides = [1, 1]} : vector<16x128xf32> to vector<2x128xf32>
    %c1_21 = arith.constant 1 : index
    %c0_22 = arith.constant 0 : index
    %c0_23 = arith.constant 0 : index
    %39 = vector.load %arg5[%c1_21, %c0_22, %c0_23] : memref<8x2x128xf32, #tpu.memory_space<vmem>>, vector<1x2x128xf32>
    %40 = vector.shape_cast %39 : vector<1x2x128xf32> to vector<2x128xf32>
    %41 = vector.shape_cast %38 : vector<2x128xf32> to vector<1x2x128xf32>
    tpu.vector_store %arg5[%c1_21, %c0_22, %c0_23], %41 {strides = array<i32>} : memref<8x2x128xf32, #tpu.memory_space<vmem>>, vector<1x2x128xf32>,
    %42 = vector.extract_strided_slice %33 {offsets = [4, 0], sizes = [2, 128], strides = [1, 1]} : vector<16x128xf32> to vector<2x128xf32>
    %c2_24 = arith.constant 2 : index
    %c0_25 = arith.constant 0 : index
    %c0_26 = arith.constant 0 : index
    %43 = vector.load %arg5[%c2_24, %c0_25, %c0_26] : memref<8x2x128xf32, #tpu.memory_space<vmem>>, vector<1x2x128xf32>
    %44 = vector.shape_cast %43 : vector<1x2x128xf32> to vector<2x128xf32>
    %45 = vector.shape_cast %42 : vector<2x128xf32> to vector<1x2x128xf32>
    tpu.vector_store %arg5[%c2_24, %c0_25, %c0_26], %45 {strides = array<i32>} : memref<8x2x128xf32, #tpu.memory_space<vmem>>, vector<1x2x128xf32>,
    %46 = vector.extract_strided_slice %33 {offsets = [6, 0], sizes = [2, 128], strides = [1, 1]} : vector<16x128xf32> to vector<2x128xf32>
    %c3_27 = arith.constant 3 : index
    %c0_28 = arith.constant 0 : index
    %c0_29 = arith.constant 0 : index
    %47 = vector.load %arg5[%c3_27, %c0_28, %c0_29] : memref<8x2x128xf32, #tpu.memory_space<vmem>>, vector<1x2x128xf32>
    %48 = vector.shape_cast %47 : vector<1x2x128xf32> to vector<2x128xf32>
    %49 = vector.shape_cast %46 : vector<2x128xf32> to vector<1x2x128xf32>
    tpu.vector_store %arg5[%c3_27, %c0_28, %c0_29], %49 {strides = array<i32>} : memref<8x2x128xf32, #tpu.memory_space<vmem>>, vector<1x2x128xf32>,
    %50 = vector.extract_strided_slice %33 {offsets = [8, 0], sizes = [2, 128], strides = [1, 1]} : vector<16x128xf32> to vector<2x128xf32>
    %c4 = arith.constant 4 : index
    %c0_30 = arith.constant 0 : index
    %c0_31 = arith.constant 0 : index
    %51 = vector.load %arg5[%c4, %c0_30, %c0_31] : memref<8x2x128xf32, #tpu.memory_space<vmem>>, vector<1x2x128xf32>
    %52 = vector.shape_cast %51 : vector<1x2x128xf32> to vector<2x128xf32>
    %53 = vector.shape_cast %50 : vector<2x128xf32> to vector<1x2x128xf32>
    tpu.vector_store %arg5[%c4, %c0_30, %c0_31], %53 {strides = array<i32>} : memref<8x2x128xf32, #tpu.memory_space<vmem>>, vector<1x2x128xf32>,
    %54 = vector.extract_strided_slice %33 {offsets = [10, 0], sizes = [2, 128], strides = [1, 1]} : vector<16x128xf32> to vector<2x128xf32>
    %c5 = arith.constant 5 : index
    %c0_32 = arith.constant 0 : index
    %c0_33 = arith.constant 0 : index
    %55 = vector.load %arg5[%c5, %c0_32, %c0_33] : memref<8x2x128xf32, #tpu.memory_space<vmem>>, vector<1x2x128xf32>
    %56 = vector.shape_cast %55 : vector<1x2x128xf32> to vector<2x128xf32>
    %57 = vector.shape_cast %54 : vector<2x128xf32> to vector<1x2x128xf32>
    tpu.vector_store %arg5[%c5, %c0_32, %c0_33], %57 {strides = array<i32>} : memref<8x2x128xf32, #tpu.memory_space<vmem>>, vector<1x2x128xf32>,
    %58 = vector.extract_strided_slice %33 {offsets = [12, 0], sizes = [2, 128], strides = [1, 1]} : vector<16x128xf32> to vector<2x128xf32>
    %c6 = arith.constant 6 : index
    %c0_34 = arith.constant 0 : index
    %c0_35 = arith.constant 0 : index
    %59 = vector.load %arg5[%c6, %c0_34, %c0_35] : memref<8x2x128xf32, #tpu.memory_space<vmem>>, vector<1x2x128xf32>
    %60 = vector.shape_cast %59 : vector<1x2x128xf32> to vector<2x128xf32>
    %61 = vector.shape_cast %58 : vector<2x128xf32> to vector<1x2x128xf32>
    tpu.vector_store %arg5[%c6, %c0_34, %c0_35], %61 {strides = array<i32>} : memref<8x2x128xf32, #tpu.memory_space<vmem>>, vector<1x2x128xf32>,
    %62 = vector.extract_strided_slice %33 {offsets = [14, 0], sizes = [2, 128], strides = [1, 1]} : vector<16x128xf32> to vector<2x128xf32>
    %c7 = arith.constant 7 : index
    %c0_36 = arith.constant 0 : index
    %c0_37 = arith.constant 0 : index
    %63 = vector.load %arg5[%c7, %c0_36, %c0_37] : memref<8x2x128xf32, #tpu.memory_space<vmem>>, vector<1x2x128xf32>
    %64 = vector.shape_cast %63 : vector<1x2x128xf32> to vector<2x128xf32>
    %65 = vector.shape_cast %62 : vector<2x128xf32> to vector<1x2x128xf32>
    tpu.vector_store %arg5[%c7, %c0_36, %c0_37], %65 {strides = array<i32>} : memref<8x2x128xf32, #tpu.memory_space<vmem>>, vector<1x2x128xf32>,
    %c208 = arith.constant 208 : index
    %c0_38 = arith.constant 0 : index
    %66 = vector.load %arg2[%c208, %c0_38] : memref<416x128xbf16, #tpu.memory_space<vmem>>, vector<44x128xbf16>
    %c256 = arith.constant 256 : index
    %c0_39 = arith.constant 0 : index
    %67 = vector.load %arg2[%c256, %c0_39] : memref<416x128xbf16, #tpu.memory_space<vmem>>, vector<64x128xbf16>
    %c320 = arith.constant 320 : index
    %c0_40 = arith.constant 0 : index
    %68 = vector.load %arg2[%c320, %c0_40] : memref<416x128xbf16, #tpu.memory_space<vmem>>, vector<64x128xbf16>
    %c5_41 = arith.constant 5 : index
    %c0_42 = arith.constant 0 : index
    %69 = vector.load %arg3[%c5_41, %c0_42] : memref<8x128xf32, #tpu.memory_space<vmem>>, vector<1x128xf32>
    %c4_43 = arith.constant 4 : index
    %c0_44 = arith.constant 0 : index
    %70 = vector.load %arg3[%c4_43, %c0_44] : memref<8x128xf32, #tpu.memory_space<vmem>>, vector<1x128xf32>
    %c7_45 = arith.constant 7 : index
    %c0_46 = arith.constant 0 : index
    %71 = vector.load %arg3[%c7_45, %c0_46] : memref<8x128xf32, #tpu.memory_space<vmem>>, vector<1x128xf32>
    %c0_47 = arith.constant 0 : index
    %c0_48 = arith.constant 0 : index
    %72 = vector.load %arg1[%c0_47, %c0_48] : memref<2x88xf32, #tpu.memory_space<vmem>>, vector<2x12xf32>
    %c0_49 = arith.constant 0 : index
    %c0_50 = arith.constant 0 : index
    %c0_51 = arith.constant 0 : index
    %73 = vector.load %arg5[%c0_49, %c0_50, %c0_51] : memref<8x2x128xf32, #tpu.memory_space<vmem>>, vector<1x2x128xf32>
    %74 = vector.shape_cast %73 : vector<1x2x128xf32> to vector<2x128xf32>
    %75 = tpu.concatenate %72, %23 in 1 : vector<2x12xf32>, vector<2x32xf32> -> vector<2x44xf32>
    %76 = arith.truncf %75 : vector<2x44xf32> to vector<2x44xbf16>
    %cst_52 = arith.constant dense<0.000000e+00> : vector<2x128xf32>
    %77 = tpu.matmul %76, %66, %cst_52 {dimension_numbers = #tpu.dot_dimension_numbers<[1], [0], [0], [1], [0, 0, 1, 1], [], []>} : vector<2x44xbf16>, vector<44x128xbf16>, vector<2x128xf32> -> vector<2x128xf32>
    %78 = arith.addf %74, %77 : vector<2x128xf32>
    %79 = vector.broadcast %71 : vector<1x128xf32> to vector<2x128xf32>
    %80 = arith.mulf %78, %79 : vector<2x128xf32>
    %81 = math.tanh %80 : vector<2x128xf32>
    %cst_53 = arith.constant 5.000000e-01 : f32
    %82 = vector.broadcast %cst_53 : f32 to vector<2x128xf32>
    %83 = arith.mulf %82, %81 : vector<2x128xf32>
    %cst_54 = arith.constant 5.000000e-01 : f32
    %84 = vector.broadcast %cst_54 : f32 to vector<2x128xf32>
    %85 = arith.addf %83, %84 : vector<2x128xf32>
    %86 = vector.extract_strided_slice %85 {offsets = [0, 32], sizes = [2, 32], strides = [1, 1]} : vector<2x128xf32> to vector<2x32xf32>
    %87 = arith.mulf %86, %25 : vector<2x32xf32>
    %88 = vector.extract_strided_slice %85 {offsets = [0, 0], sizes = [2, 32], strides = [1, 1]} : vector<2x128xf32> to vector<2x32xf32>
    %89 = vector.extract_strided_slice %81 {offsets = [0, 64], sizes = [2, 32], strides = [1, 1]} : vector<2x128xf32> to vector<2x32xf32>
    %90 = arith.mulf %88, %89 : vector<2x32xf32>
    %91 = arith.addf %87, %90 : vector<2x32xf32>
    %92 = vector.extract_strided_slice %85 {offsets = [0, 96], sizes = [2, 32], strides = [1, 1]} : vector<2x128xf32> to vector<2x32xf32>
    %93 = math.tanh %91 : vector<2x32xf32>
    %94 = arith.mulf %92, %93 : vector<2x32xf32>
    %95 = tpu.concatenate %94, %24 in 1 : vector<2x32xf32>, vector<2x32xf32> -> vector<2x64xf32>
    %96 = arith.truncf %95 : vector<2x64xf32> to vector<2x64xbf16>
    %cst_55 = arith.constant dense<0.000000e+00> : vector<2x128xf32>
    %97 = tpu.matmul %96, %68, %cst_55 {dimension_numbers = #tpu.dot_dimension_numbers<[1], [0], [0], [1], [0, 0, 1, 1], [], []>} : vector<2x64xbf16>, vector<64x128xbf16>, vector<2x128xf32> -> vector<2x128xf32>
    %98 = vector.broadcast %69 : vector<1x128xf32> to vector<2x128xf32>
    %99 = arith.addf %97, %98 : vector<2x128xf32>
    %100 = vector.broadcast %71 : vector<1x128xf32> to vector<2x128xf32>
    %101 = arith.mulf %99, %100 : vector<2x128xf32>
    %102 = math.tanh %101 : vector<2x128xf32>
    %cst_56 = arith.constant 5.000000e-01 : f32
    %103 = vector.broadcast %cst_56 : f32 to vector<2x128xf32>
    %104 = arith.mulf %103, %102 : vector<2x128xf32>
    %cst_57 = arith.constant 5.000000e-01 : f32
    %105 = vector.broadcast %cst_57 : f32 to vector<2x128xf32>
    %106 = arith.addf %104, %105 : vector<2x128xf32>
    %107 = vector.extract_strided_slice %106 {offsets = [0, 32], sizes = [2, 32], strides = [1, 1]} : vector<2x128xf32> to vector<2x32xf32>
    %108 = arith.mulf %107, %26 : vector<2x32xf32>
    %109 = vector.extract_strided_slice %106 {offsets = [0, 0], sizes = [2, 32], strides = [1, 1]} : vector<2x128xf32> to vector<2x32xf32>
    %110 = vector.extract_strided_slice %102 {offsets = [0, 64], sizes = [2, 32], strides = [1, 1]} : vector<2x128xf32> to vector<2x32xf32>
    %111 = arith.mulf %109, %110 : vector<2x32xf32>
    %112 = arith.addf %108, %111 : vector<2x32xf32>
    %113 = vector.extract_strided_slice %106 {offsets = [0, 96], sizes = [2, 32], strides = [1, 1]} : vector<2x128xf32> to vector<2x32xf32>
    %114 = math.tanh %112 : vector<2x32xf32>
    %115 = arith.mulf %113, %114 : vector<2x32xf32>
    %116 = vector.shape_cast %115 : vector<2x32xf32> to vector<2x1x32xf32>
    %c0_58 = arith.constant 0 : index
    %c0_59 = arith.constant 0 : index
    %c0_60 = arith.constant 0 : index
    %117 = vector.load %arg4[%c0_58, %c0_59, %c0_60] : memref<2x8x44xf32, #tpu.memory_space<vmem>>, vector<2x1x32xf32>
    tpu.vector_store %arg4[%c0_58, %c0_59, %c0_60], %116 {strides = array<i32>} : memref<2x8x44xf32, #tpu.memory_space<vmem>>, vector<2x1x32xf32>,
    %c1_61 = arith.constant 1 : index
    %c0_62 = arith.constant 0 : index
    %c0_63 = arith.constant 0 : index
    %118 = vector.load %arg5[%c1_61, %c0_62, %c0_63] : memref<8x2x128xf32, #tpu.memory_space<vmem>>, vector<1x2x128xf32>
    %119 = vector.shape_cast %118 : vector<1x2x128xf32> to vector<2x128xf32>
    %120 = tpu.concatenate %115, %94 in 1 : vector<2x32xf32>, vector<2x32xf32> -> vector<2x64xf32>
    %121 = arith.truncf %120 : vector<2x64xf32> to vector<2x64xbf16>
    %cst_64 = arith.constant dense<0.000000e+00> : vector<2x128xf32>
    %122 = tpu.matmul %121, %67, %cst_64 {dimension_numbers = #tpu.dot_dimension_numbers<[1], [0], [0], [1], [0, 0, 1, 1], [], []>} : vector<2x64xbf16>, vector<64x128xbf16>, vector<2x128xf32> -> vector<2x128xf32>
    %123 = arith.addf %119, %122 : vector<2x128xf32>
    %124 = vector.broadcast %70 : vector<1x128xf32> to vector<2x128xf32>
    %125 = arith.addf %123, %124 : vector<2x128xf32>
    %126 = vector.broadcast %71 : vector<1x128xf32> to vector<2x128xf32>
    %127 = arith.mulf %125, %126 : vector<2x128xf32>
    %128 = math.tanh %127 : vector<2x128xf32>
    %cst_65 = arith.constant 5.000000e-01 : f32
    %129 = vector.broadcast %cst_65 : f32 to vector<2x128xf32>
    %130 = arith.mulf %129, %128 : vector<2x128xf32>
    %cst_66 = arith.constant 5.000000e-01 : f32
    %131 = vector.broadcast %cst_66 : f32 to vector<2x128xf32>
    %132 = arith.addf %130, %131 : vector<2x128xf32>
    %133 = vector.extract_strided_slice %132 {offsets = [0, 32], sizes = [2, 32], strides = [1, 1]} : vector<2x128xf32> to vector<2x32xf32>
    %134 = arith.mulf %133, %91 : vector<2x32xf32>
    %135 = vector.extract_strided_slice %132 {offsets = [0, 0], sizes = [2, 32], strides = [1, 1]} : vector<2x128xf32> to vector<2x32xf32>
    %136 = vector.extract_strided_slice %128 {offsets = [0, 64], sizes = [2, 32], strides = [1, 1]} : vector<2x128xf32> to vector<2x32xf32>
    %137 = arith.mulf %135, %136 : vector<2x32xf32>
    %138 = arith.addf %134, %137 : vector<2x32xf32>
    %139 = vector.extract_strided_slice %132 {offsets = [0, 96], sizes = [2, 32], strides = [1, 1]} : vector<2x128xf32> to vector<2x32xf32>
    %140 = math.tanh %138 : vector<2x32xf32>
    %141 = arith.mulf %139, %140 : vector<2x32xf32>
    %142 = tpu.concatenate %141, %115 in 1 : vector<2x32xf32>, vector<2x32xf32> -> vector<2x64xf32>
    %143 = arith.truncf %142 : vector<2x64xf32> to vector<2x64xbf16>
    %cst_67 = arith.constant dense<0.000000e+00> : vector<2x128xf32>
    %144 = tpu.matmul %143, %68, %cst_67 {dimension_numbers = #tpu.dot_dimension_numbers<[1], [0], [0], [1], [0, 0, 1, 1], [], []>} : vector<2x64xbf16>, vector<64x128xbf16>, vector<2x128xf32> -> vector<2x128xf32>
    %145 = vector.broadcast %69 : vector<1x128xf32> to vector<2x128xf32>
    %146 = arith.addf %144, %145 : vector<2x128xf32>
    %147 = vector.broadcast %71 : vector<1x128xf32> to vector<2x128xf32>
    %148 = arith.mulf %146, %147 : vector<2x128xf32>
    %149 = math.tanh %148 : vector<2x128xf32>
    %cst_68 = arith.constant 5.000000e-01 : f32
    %150 = vector.broadcast %cst_68 : f32 to vector<2x128xf32>
    %151 = arith.mulf %150, %149 : vector<2x128xf32>
    %cst_69 = arith.constant 5.000000e-01 : f32
    %152 = vector.broadcast %cst_69 : f32 to vector<2x128xf32>
    %153 = arith.addf %151, %152 : vector<2x128xf32>
    %154 = vector.extract_strided_slice %153 {offsets = [0, 32], sizes = [2, 32], strides = [1, 1]} : vector<2x128xf32> to vector<2x32xf32>
    %155 = arith.mulf %154, %112 : vector<2x32xf32>
    %156 = vector.extract_strided_slice %153 {offsets = [0, 0], sizes = [2, 32], strides = [1, 1]} : vector<2x128xf32> to vector<2x32xf32>
    %157 = vector.extract_strided_slice %149 {offsets = [0, 64], sizes = [2, 32], strides = [1, 1]} : vector<2x128xf32> to vector<2x32xf32>
    %158 = arith.mulf %156, %157 : vector<2x32xf32>
    %159 = arith.addf %155, %158 : vector<2x32xf32>
    %160 = vector.extract_strided_slice %153 {offsets = [0, 96], sizes = [2, 32], strides = [1, 1]} : vector<2x128xf32> to vector<2x32xf32>
    %161 = math.tanh %159 : vector<2x32xf32>
    %162 = arith.mulf %160, %161 : vector<2x32xf32>
    %163 = vector.shape_cast %162 : vector<2x32xf32> to vector<2x1x32xf32>
    %c0_70 = arith.constant 0 : index
    %c1_71 = arith.constant 1 : index
    %c0_72 = arith.constant 0 : index
    %164 = vector.load %arg4[%c0_70, %c1_71, %c0_72] : memref<2x8x44xf32, #tpu.memory_space<vmem>>, vector<2x1x32xf32>
    tpu.vector_store %arg4[%c0_70, %c1_71, %c0_72], %163 {strides = array<i32>} : memref<2x8x44xf32, #tpu.memory_space<vmem>>, vector<2x1x32xf32>,
    %c2_73 = arith.constant 2 : index
    %c0_74 = arith.constant 0 : index
    %c0_75 = arith.constant 0 : index
    %165 = vector.load %arg5[%c2_73, %c0_74, %c0_75] : memref<8x2x128xf32, #tpu.memory_space<vmem>>, vector<1x2x128xf32>
    %166 = vector.shape_cast %165 : vector<1x2x128xf32> to vector<2x128xf32>
    %167 = tpu.concatenate %162, %141 in 1 : vector<2x32xf32>, vector<2x32xf32> -> vector<2x64xf32>
    %168 = arith.truncf %167 : vector<2x64xf32> to vector<2x64xbf16>
    %cst_76 = arith.constant dense<0.000000e+00> : vector<2x128xf32>
    %169 = tpu.matmul %168, %67, %cst_76 {dimension_numbers = #tpu.dot_dimension_numbers<[1], [0], [0], [1], [0, 0, 1, 1], [], []>} : vector<2x64xbf16>, vector<64x128xbf16>, vector<2x128xf32> -> vector<2x128xf32>
    %170 = arith.addf %166, %169 : vector<2x128xf32>
    %171 = vector.broadcast %70 : vector<1x128xf32> to vector<2x128xf32>
    %172 = arith.addf %170, %171 : vector<2x128xf32>
    %173 = vector.broadcast %71 : vector<1x128xf32> to vector<2x128xf32>
    %174 = arith.mulf %172, %173 : vector<2x128xf32>
    %175 = math.tanh %174 : vector<2x128xf32>
    %cst_77 = arith.constant 5.000000e-01 : f32
    %176 = vector.broadcast %cst_77 : f32 to vector<2x128xf32>
    %177 = arith.mulf %176, %175 : vector<2x128xf32>
    %cst_78 = arith.constant 5.000000e-01 : f32
    %178 = vector.broadcast %cst_78 : f32 to vector<2x128xf32>
    %179 = arith.addf %177, %178 : vector<2x128xf32>
    %180 = vector.extract_strided_slice %179 {offsets = [0, 32], sizes = [2, 32], strides = [1, 1]} : vector<2x128xf32> to vector<2x32xf32>
    %181 = arith.mulf %180, %138 : vector<2x32xf32>
    %182 = vector.extract_strided_slice %179 {offsets = [0, 0], sizes = [2, 32], strides = [1, 1]} : vector<2x128xf32> to vector<2x32xf32>
    %183 = vector.extract_strided_slice %175 {offsets = [0, 64], sizes = [2, 32], strides = [1, 1]} : vector<2x128xf32> to vector<2x32xf32>
    %184 = arith.mulf %182, %183 : vector<2x32xf32>
    %185 = arith.addf %181, %184 : vector<2x32xf32>
    %186 = vector.extract_strided_slice %179 {offsets = [0, 96], sizes = [2, 32], strides = [1, 1]} : vector<2x128xf32> to vector<2x32xf32>
    %187 = math.tanh %185 : vector<2x32xf32>
    %188 = arith.mulf %186, %187 : vector<2x32xf32>
    %189 = tpu.concatenate %188, %162 in 1 : vector<2x32xf32>, vector<2x32xf32> -> vector<2x64xf32>
    %190 = arith.truncf %189 : vector<2x64xf32> to vector<2x64xbf16>
    %cst_79 = arith.constant dense<0.000000e+00> : vector<2x128xf32>
    %191 = tpu.matmul %190, %68, %cst_79 {dimension_numbers = #tpu.dot_dimension_numbers<[1], [0], [0], [1], [0, 0, 1, 1], [], []>} : vector<2x64xbf16>, vector<64x128xbf16>, vector<2x128xf32> -> vector<2x128xf32>
    %192 = vector.broadcast %69 : vector<1x128xf32> to vector<2x128xf32>
    %193 = arith.addf %191, %192 : vector<2x128xf32>
    %194 = vector.broadcast %71 : vector<1x128xf32> to vector<2x128xf32>
    %195 = arith.mulf %193, %194 : vector<2x128xf32>
    %196 = math.tanh %195 : vector<2x128xf32>
    %cst_80 = arith.constant 5.000000e-01 : f32
    %197 = vector.broadcast %cst_80 : f32 to vector<2x128xf32>
    %198 = arith.mulf %197, %196 : vector<2x128xf32>
    %cst_81 = arith.constant 5.000000e-01 : f32
    %199 = vector.broadcast %cst_81 : f32 to vector<2x128xf32>
    %200 = arith.addf %198, %199 : vector<2x128xf32>
    %201 = vector.extract_strided_slice %200 {offsets = [0, 32], sizes = [2, 32], strides = [1, 1]} : vector<2x128xf32> to vector<2x32xf32>
    %202 = arith.mulf %201, %159 : vector<2x32xf32>
    %203 = vector.extract_strided_slice %200 {offsets = [0, 0], sizes = [2, 32], strides = [1, 1]} : vector<2x128xf32> to vector<2x32xf32>
    %204 = vector.extract_strided_slice %196 {offsets = [0, 64], sizes = [2, 32], strides = [1, 1]} : vector<2x128xf32> to vector<2x32xf32>
    %205 = arith.mulf %203, %204 : vector<2x32xf32>
    %206 = arith.addf %202, %205 : vector<2x32xf32>
    %207 = vector.extract_strided_slice %200 {offsets = [0, 96], sizes = [2, 32], strides = [1, 1]} : vector<2x128xf32> to vector<2x32xf32>
    %208 = math.tanh %206 : vector<2x32xf32>
    %209 = arith.mulf %207, %208 : vector<2x32xf32>
    %210 = vector.shape_cast %209 : vector<2x32xf32> to vector<2x1x32xf32>
    %c0_82 = arith.constant 0 : index
    %c2_83 = arith.constant 2 : index
    %c0_84 = arith.constant 0 : index
    %211 = vector.load %arg4[%c0_82, %c2_83, %c0_84] : memref<2x8x44xf32, #tpu.memory_space<vmem>>, vector<2x1x32xf32>
    tpu.vector_store %arg4[%c0_82, %c2_83, %c0_84], %210 {strides = array<i32>} : memref<2x8x44xf32, #tpu.memory_space<vmem>>, vector<2x1x32xf32>,
    %c3_85 = arith.constant 3 : index
    %c0_86 = arith.constant 0 : index
    %c0_87 = arith.constant 0 : index
    %212 = vector.load %arg5[%c3_85, %c0_86, %c0_87] : memref<8x2x128xf32, #tpu.memory_space<vmem>>, vector<1x2x128xf32>
    %213 = vector.shape_cast %212 : vector<1x2x128xf32> to vector<2x128xf32>
    %214 = tpu.concatenate %209, %188 in 1 : vector<2x32xf32>, vector<2x32xf32> -> vector<2x64xf32>
    %215 = arith.truncf %214 : vector<2x64xf32> to vector<2x64xbf16>
    %cst_88 = arith.constant dense<0.000000e+00> : vector<2x128xf32>
    %216 = tpu.matmul %215, %67, %cst_88 {dimension_numbers = #tpu.dot_dimension_numbers<[1], [0], [0], [1], [0, 0, 1, 1], [], []>} : vector<2x64xbf16>, vector<64x128xbf16>, vector<2x128xf32> -> vector<2x128xf32>
    %217 = arith.addf %213, %216 : vector<2x128xf32>
    %218 = vector.broadcast %70 : vector<1x128xf32> to vector<2x128xf32>
    %219 = arith.addf %217, %218 : vector<2x128xf32>
    %220 = vector.broadcast %71 : vector<1x128xf32> to vector<2x128xf32>
    %221 = arith.mulf %219, %220 : vector<2x128xf32>
    %222 = math.tanh %221 : vector<2x128xf32>
    %cst_89 = arith.constant 5.000000e-01 : f32
    %223 = vector.broadcast %cst_89 : f32 to vector<2x128xf32>
    %224 = arith.mulf %223, %222 : vector<2x128xf32>
    %cst_90 = arith.constant 5.000000e-01 : f32
    %225 = vector.broadcast %cst_90 : f32 to vector<2x128xf32>
    %226 = arith.addf %224, %225 : vector<2x128xf32>
    %227 = vector.extract_strided_slice %226 {offsets = [0, 32], sizes = [2, 32], strides = [1, 1]} : vector<2x128xf32> to vector<2x32xf32>
    %228 = arith.mulf %227, %185 : vector<2x32xf32>
    %229 = vector.extract_strided_slice %226 {offsets = [0, 0], sizes = [2, 32], strides = [1, 1]} : vector<2x128xf32> to vector<2x32xf32>
    %230 = vector.extract_strided_slice %222 {offsets = [0, 64], sizes = [2, 32], strides = [1, 1]} : vector<2x128xf32> to vector<2x32xf32>
    %231 = arith.mulf %229, %230 : vector<2x32xf32>
    %232 = arith.addf %228, %231 : vector<2x32xf32>
    %233 = vector.extract_strided_slice %226 {offsets = [0, 96], sizes = [2, 32], strides = [1, 1]} : vector<2x128xf32> to vector<2x32xf32>
    %234 = math.tanh %232 : vector<2x32xf32>
    %235 = arith.mulf %233, %234 : vector<2x32xf32>
    %236 = tpu.concatenate %235, %209 in 1 : vector<2x32xf32>, vector<2x32xf32> -> vector<2x64xf32>
    %237 = arith.truncf %236 : vector<2x64xf32> to vector<2x64xbf16>
    %cst_91 = arith.constant dense<0.000000e+00> : vector<2x128xf32>
    %238 = tpu.matmul %237, %68, %cst_91 {dimension_numbers = #tpu.dot_dimension_numbers<[1], [0], [0], [1], [0, 0, 1, 1], [], []>} : vector<2x64xbf16>, vector<64x128xbf16>, vector<2x128xf32> -> vector<2x128xf32>
    %239 = vector.broadcast %69 : vector<1x128xf32> to vector<2x128xf32>
    %240 = arith.addf %238, %239 : vector<2x128xf32>
    %241 = vector.broadcast %71 : vector<1x128xf32> to vector<2x128xf32>
    %242 = arith.mulf %240, %241 : vector<2x128xf32>
    %243 = math.tanh %242 : vector<2x128xf32>
    %cst_92 = arith.constant 5.000000e-01 : f32
    %244 = vector.broadcast %cst_92 : f32 to vector<2x128xf32>
    %245 = arith.mulf %244, %243 : vector<2x128xf32>
    %cst_93 = arith.constant 5.000000e-01 : f32
    %246 = vector.broadcast %cst_93 : f32 to vector<2x128xf32>
    %247 = arith.addf %245, %246 : vector<2x128xf32>
    %248 = vector.extract_strided_slice %247 {offsets = [0, 32], sizes = [2, 32], strides = [1, 1]} : vector<2x128xf32> to vector<2x32xf32>
    %249 = arith.mulf %248, %206 : vector<2x32xf32>
    %250 = vector.extract_strided_slice %247 {offsets = [0, 0], sizes = [2, 32], strides = [1, 1]} : vector<2x128xf32> to vector<2x32xf32>
    %251 = vector.extract_strided_slice %243 {offsets = [0, 64], sizes = [2, 32], strides = [1, 1]} : vector<2x128xf32> to vector<2x32xf32>
    %252 = arith.mulf %250, %251 : vector<2x32xf32>
    %253 = arith.addf %249, %252 : vector<2x32xf32>
    %254 = vector.extract_strided_slice %247 {offsets = [0, 96], sizes = [2, 32], strides = [1, 1]} : vector<2x128xf32> to vector<2x32xf32>
    %255 = math.tanh %253 : vector<2x32xf32>
    %256 = arith.mulf %254, %255 : vector<2x32xf32>
    %257 = vector.shape_cast %256 : vector<2x32xf32> to vector<2x1x32xf32>
    %c0_94 = arith.constant 0 : index
    %c3_95 = arith.constant 3 : index
    %c0_96 = arith.constant 0 : index
    %258 = vector.load %arg4[%c0_94, %c3_95, %c0_96] : memref<2x8x44xf32, #tpu.memory_space<vmem>>, vector<2x1x32xf32>
    tpu.vector_store %arg4[%c0_94, %c3_95, %c0_96], %257 {strides = array<i32>} : memref<2x8x44xf32, #tpu.memory_space<vmem>>, vector<2x1x32xf32>,
    %c4_97 = arith.constant 4 : index
    %c0_98 = arith.constant 0 : index
    %c0_99 = arith.constant 0 : index
    %259 = vector.load %arg5[%c4_97, %c0_98, %c0_99] : memref<8x2x128xf32, #tpu.memory_space<vmem>>, vector<1x2x128xf32>
    %260 = vector.shape_cast %259 : vector<1x2x128xf32> to vector<2x128xf32>
    %261 = tpu.concatenate %256, %235 in 1 : vector<2x32xf32>, vector<2x32xf32> -> vector<2x64xf32>
    %262 = arith.truncf %261 : vector<2x64xf32> to vector<2x64xbf16>
    %cst_100 = arith.constant dense<0.000000e+00> : vector<2x128xf32>
    %263 = tpu.matmul %262, %67, %cst_100 {dimension_numbers = #tpu.dot_dimension_numbers<[1], [0], [0], [1], [0, 0, 1, 1], [], []>} : vector<2x64xbf16>, vector<64x128xbf16>, vector<2x128xf32> -> vector<2x128xf32>
    %264 = arith.addf %260, %263 : vector<2x128xf32>
    %265 = vector.broadcast %70 : vector<1x128xf32> to vector<2x128xf32>
    %266 = arith.addf %264, %265 : vector<2x128xf32>
    %267 = vector.broadcast %71 : vector<1x128xf32> to vector<2x128xf32>
    %268 = arith.mulf %266, %267 : vector<2x128xf32>
    %269 = math.tanh %268 : vector<2x128xf32>
    %cst_101 = arith.constant 5.000000e-01 : f32
    %270 = vector.broadcast %cst_101 : f32 to vector<2x128xf32>
    %271 = arith.mulf %270, %269 : vector<2x128xf32>
    %cst_102 = arith.constant 5.000000e-01 : f32
    %272 = vector.broadcast %cst_102 : f32 to vector<2x128xf32>
    %273 = arith.addf %271, %272 : vector<2x128xf32>
    %274 = vector.extract_strided_slice %273 {offsets = [0, 32], sizes = [2, 32], strides = [1, 1]} : vector<2x128xf32> to vector<2x32xf32>
    %275 = arith.mulf %274, %232 : vector<2x32xf32>
    %276 = vector.extract_strided_slice %273 {offsets = [0, 0], sizes = [2, 32], strides = [1, 1]} : vector<2x128xf32> to vector<2x32xf32>
    %277 = vector.extract_strided_slice %269 {offsets = [0, 64], sizes = [2, 32], strides = [1, 1]} : vector<2x128xf32> to vector<2x32xf32>
    %278 = arith.mulf %276, %277 : vector<2x32xf32>
    %279 = arith.addf %275, %278 : vector<2x32xf32>
    %280 = vector.extract_strided_slice %273 {offsets = [0, 96], sizes = [2, 32], strides = [1, 1]} : vector<2x128xf32> to vector<2x32xf32>
    %281 = math.tanh %279 : vector<2x32xf32>
    %282 = arith.mulf %280, %281 : vector<2x32xf32>
    %283 = tpu.concatenate %282, %256 in 1 : vector<2x32xf32>, vector<2x32xf32> -> vector<2x64xf32>
    %284 = arith.truncf %283 : vector<2x64xf32> to vector<2x64xbf16>
    %cst_103 = arith.constant dense<0.000000e+00> : vector<2x128xf32>
    %285 = tpu.matmul %284, %68, %cst_103 {dimension_numbers = #tpu.dot_dimension_numbers<[1], [0], [0], [1], [0, 0, 1, 1], [], []>} : vector<2x64xbf16>, vector<64x128xbf16>, vector<2x128xf32> -> vector<2x128xf32>
    %286 = vector.broadcast %69 : vector<1x128xf32> to vector<2x128xf32>
    %287 = arith.addf %285, %286 : vector<2x128xf32>
    %288 = vector.broadcast %71 : vector<1x128xf32> to vector<2x128xf32>
    %289 = arith.mulf %287, %288 : vector<2x128xf32>
    %290 = math.tanh %289 : vector<2x128xf32>
    %cst_104 = arith.constant 5.000000e-01 : f32
    %291 = vector.broadcast %cst_104 : f32 to vector<2x128xf32>
    %292 = arith.mulf %291, %290 : vector<2x128xf32>
    %cst_105 = arith.constant 5.000000e-01 : f32
    %293 = vector.broadcast %cst_105 : f32 to vector<2x128xf32>
    %294 = arith.addf %292, %293 : vector<2x128xf32>
    %295 = vector.extract_strided_slice %294 {offsets = [0, 32], sizes = [2, 32], strides = [1, 1]} : vector<2x128xf32> to vector<2x32xf32>
    %296 = arith.mulf %295, %253 : vector<2x32xf32>
    %297 = vector.extract_strided_slice %294 {offsets = [0, 0], sizes = [2, 32], strides = [1, 1]} : vector<2x128xf32> to vector<2x32xf32>
    %298 = vector.extract_strided_slice %290 {offsets = [0, 64], sizes = [2, 32], strides = [1, 1]} : vector<2x128xf32> to vector<2x32xf32>
    %299 = arith.mulf %297, %298 : vector<2x32xf32>
    %300 = arith.addf %296, %299 : vector<2x32xf32>
    %301 = vector.extract_strided_slice %294 {offsets = [0, 96], sizes = [2, 32], strides = [1, 1]} : vector<2x128xf32> to vector<2x32xf32>
    %302 = math.tanh %300 : vector<2x32xf32>
    %303 = arith.mulf %301, %302 : vector<2x32xf32>
    %304 = vector.shape_cast %303 : vector<2x32xf32> to vector<2x1x32xf32>
    %c0_106 = arith.constant 0 : index
    %c4_107 = arith.constant 4 : index
    %c0_108 = arith.constant 0 : index
    %305 = vector.load %arg4[%c0_106, %c4_107, %c0_108] : memref<2x8x44xf32, #tpu.memory_space<vmem>>, vector<2x1x32xf32>
    tpu.vector_store %arg4[%c0_106, %c4_107, %c0_108], %304 {strides = array<i32>} : memref<2x8x44xf32, #tpu.memory_space<vmem>>, vector<2x1x32xf32>,
    %c5_109 = arith.constant 5 : index
    %c0_110 = arith.constant 0 : index
    %c0_111 = arith.constant 0 : index
    %306 = vector.load %arg5[%c5_109, %c0_110, %c0_111] : memref<8x2x128xf32, #tpu.memory_space<vmem>>, vector<1x2x128xf32>
    %307 = vector.shape_cast %306 : vector<1x2x128xf32> to vector<2x128xf32>
    %308 = tpu.concatenate %303, %282 in 1 : vector<2x32xf32>, vector<2x32xf32> -> vector<2x64xf32>
    %309 = arith.truncf %308 : vector<2x64xf32> to vector<2x64xbf16>
    %cst_112 = arith.constant dense<0.000000e+00> : vector<2x128xf32>
    %310 = tpu.matmul %309, %67, %cst_112 {dimension_numbers = #tpu.dot_dimension_numbers<[1], [0], [0], [1], [0, 0, 1, 1], [], []>} : vector<2x64xbf16>, vector<64x128xbf16>, vector<2x128xf32> -> vector<2x128xf32>
    %311 = arith.addf %307, %310 : vector<2x128xf32>
    %312 = vector.broadcast %70 : vector<1x128xf32> to vector<2x128xf32>
    %313 = arith.addf %311, %312 : vector<2x128xf32>
    %314 = vector.broadcast %71 : vector<1x128xf32> to vector<2x128xf32>
    %315 = arith.mulf %313, %314 : vector<2x128xf32>
    %316 = math.tanh %315 : vector<2x128xf32>
    %cst_113 = arith.constant 5.000000e-01 : f32
    %317 = vector.broadcast %cst_113 : f32 to vector<2x128xf32>
    %318 = arith.mulf %317, %316 : vector<2x128xf32>
    %cst_114 = arith.constant 5.000000e-01 : f32
    %319 = vector.broadcast %cst_114 : f32 to vector<2x128xf32>
    %320 = arith.addf %318, %319 : vector<2x128xf32>
    %321 = vector.extract_strided_slice %320 {offsets = [0, 32], sizes = [2, 32], strides = [1, 1]} : vector<2x128xf32> to vector<2x32xf32>
    %322 = arith.mulf %321, %279 : vector<2x32xf32>
    %323 = vector.extract_strided_slice %320 {offsets = [0, 0], sizes = [2, 32], strides = [1, 1]} : vector<2x128xf32> to vector<2x32xf32>
    %324 = vector.extract_strided_slice %316 {offsets = [0, 64], sizes = [2, 32], strides = [1, 1]} : vector<2x128xf32> to vector<2x32xf32>
    %325 = arith.mulf %323, %324 : vector<2x32xf32>
    %326 = arith.addf %322, %325 : vector<2x32xf32>
    %327 = vector.extract_strided_slice %320 {offsets = [0, 96], sizes = [2, 32], strides = [1, 1]} : vector<2x128xf32> to vector<2x32xf32>
    %328 = math.tanh %326 : vector<2x32xf32>
    %329 = arith.mulf %327, %328 : vector<2x32xf32>
    %330 = tpu.concatenate %329, %303 in 1 : vector<2x32xf32>, vector<2x32xf32> -> vector<2x64xf32>
    %331 = arith.truncf %330 : vector<2x64xf32> to vector<2x64xbf16>
    %cst_115 = arith.constant dense<0.000000e+00> : vector<2x128xf32>
    %332 = tpu.matmul %331, %68, %cst_115 {dimension_numbers = #tpu.dot_dimension_numbers<[1], [0], [0], [1], [0, 0, 1, 1], [], []>} : vector<2x64xbf16>, vector<64x128xbf16>, vector<2x128xf32> -> vector<2x128xf32>
    %333 = vector.broadcast %69 : vector<1x128xf32> to vector<2x128xf32>
    %334 = arith.addf %332, %333 : vector<2x128xf32>
    %335 = vector.broadcast %71 : vector<1x128xf32> to vector<2x128xf32>
    %336 = arith.mulf %334, %335 : vector<2x128xf32>
    %337 = math.tanh %336 : vector<2x128xf32>
    %cst_116 = arith.constant 5.000000e-01 : f32
    %338 = vector.broadcast %cst_116 : f32 to vector<2x128xf32>
    %339 = arith.mulf %338, %337 : vector<2x128xf32>
    %cst_117 = arith.constant 5.000000e-01 : f32
    %340 = vector.broadcast %cst_117 : f32 to vector<2x128xf32>
    %341 = arith.addf %339, %340 : vector<2x128xf32>
    %342 = vector.extract_strided_slice %341 {offsets = [0, 32], sizes = [2, 32], strides = [1, 1]} : vector<2x128xf32> to vector<2x32xf32>
    %343 = arith.mulf %342, %300 : vector<2x32xf32>
    %344 = vector.extract_strided_slice %341 {offsets = [0, 0], sizes = [2, 32], strides = [1, 1]} : vector<2x128xf32> to vector<2x32xf32>
    %345 = vector.extract_strided_slice %337 {offsets = [0, 64], sizes = [2, 32], strides = [1, 1]} : vector<2x128xf32> to vector<2x32xf32>
    %346 = arith.mulf %344, %345 : vector<2x32xf32>
    %347 = arith.addf %343, %346 : vector<2x32xf32>
    %348 = vector.extract_strided_slice %341 {offsets = [0, 96], sizes = [2, 32], strides = [1, 1]} : vector<2x128xf32> to vector<2x32xf32>
    %349 = math.tanh %347 : vector<2x32xf32>
    %350 = arith.mulf %348, %349 : vector<2x32xf32>
    %351 = vector.shape_cast %350 : vector<2x32xf32> to vector<2x1x32xf32>
    %c0_118 = arith.constant 0 : index
    %c5_119 = arith.constant 5 : index
    %c0_120 = arith.constant 0 : index
    %352 = vector.load %arg4[%c0_118, %c5_119, %c0_120] : memref<2x8x44xf32, #tpu.memory_space<vmem>>, vector<2x1x32xf32>
    tpu.vector_store %arg4[%c0_118, %c5_119, %c0_120], %351 {strides = array<i32>} : memref<2x8x44xf32, #tpu.memory_space<vmem>>, vector<2x1x32xf32>,
    %c6_121 = arith.constant 6 : index
    %c0_122 = arith.constant 0 : index
    %c0_123 = arith.constant 0 : index
    %353 = vector.load %arg5[%c6_121, %c0_122, %c0_123] : memref<8x2x128xf32, #tpu.memory_space<vmem>>, vector<1x2x128xf32>
    %354 = vector.shape_cast %353 : vector<1x2x128xf32> to vector<2x128xf32>
    %355 = tpu.concatenate %350, %329 in 1 : vector<2x32xf32>, vector<2x32xf32> -> vector<2x64xf32>
    %356 = arith.truncf %355 : vector<2x64xf32> to vector<2x64xbf16>
    %cst_124 = arith.constant dense<0.000000e+00> : vector<2x128xf32>
    %357 = tpu.matmul %356, %67, %cst_124 {dimension_numbers = #tpu.dot_dimension_numbers<[1], [0], [0], [1], [0, 0, 1, 1], [], []>} : vector<2x64xbf16>, vector<64x128xbf16>, vector<2x128xf32> -> vector<2x128xf32>
    %358 = arith.addf %354, %357 : vector<2x128xf32>
    %359 = vector.broadcast %70 : vector<1x128xf32> to vector<2x128xf32>
    %360 = arith.addf %358, %359 : vector<2x128xf32>
    %361 = vector.broadcast %71 : vector<1x128xf32> to vector<2x128xf32>
    %362 = arith.mulf %360, %361 : vector<2x128xf32>
    %363 = math.tanh %362 : vector<2x128xf32>
    %cst_125 = arith.constant 5.000000e-01 : f32
    %364 = vector.broadcast %cst_125 : f32 to vector<2x128xf32>
    %365 = arith.mulf %364, %363 : vector<2x128xf32>
    %cst_126 = arith.constant 5.000000e-01 : f32
    %366 = vector.broadcast %cst_126 : f32 to vector<2x128xf32>
    %367 = arith.addf %365, %366 : vector<2x128xf32>
    %368 = vector.extract_strided_slice %367 {offsets = [0, 32], sizes = [2, 32], strides = [1, 1]} : vector<2x128xf32> to vector<2x32xf32>
    %369 = arith.mulf %368, %326 : vector<2x32xf32>
    %370 = vector.extract_strided_slice %367 {offsets = [0, 0], sizes = [2, 32], strides = [1, 1]} : vector<2x128xf32> to vector<2x32xf32>
    %371 = vector.extract_strided_slice %363 {offsets = [0, 64], sizes = [2, 32], strides = [1, 1]} : vector<2x128xf32> to vector<2x32xf32>
    %372 = arith.mulf %370, %371 : vector<2x32xf32>
    %373 = arith.addf %369, %372 : vector<2x32xf32>
    %374 = vector.extract_strided_slice %367 {offsets = [0, 96], sizes = [2, 32], strides = [1, 1]} : vector<2x128xf32> to vector<2x32xf32>
    %375 = math.tanh %373 : vector<2x32xf32>
    %376 = arith.mulf %374, %375 : vector<2x32xf32>
    %377 = tpu.concatenate %376, %350 in 1 : vector<2x32xf32>, vector<2x32xf32> -> vector<2x64xf32>
    %378 = arith.truncf %377 : vector<2x64xf32> to vector<2x64xbf16>
    %cst_127 = arith.constant dense<0.000000e+00> : vector<2x128xf32>
    %379 = tpu.matmul %378, %68, %cst_127 {dimension_numbers = #tpu.dot_dimension_numbers<[1], [0], [0], [1], [0, 0, 1, 1], [], []>} : vector<2x64xbf16>, vector<64x128xbf16>, vector<2x128xf32> -> vector<2x128xf32>
    %380 = vector.broadcast %69 : vector<1x128xf32> to vector<2x128xf32>
    %381 = arith.addf %379, %380 : vector<2x128xf32>
    %382 = vector.broadcast %71 : vector<1x128xf32> to vector<2x128xf32>
    %383 = arith.mulf %381, %382 : vector<2x128xf32>
    %384 = math.tanh %383 : vector<2x128xf32>
    %cst_128 = arith.constant 5.000000e-01 : f32
    %385 = vector.broadcast %cst_128 : f32 to vector<2x128xf32>
    %386 = arith.mulf %385, %384 : vector<2x128xf32>
    %cst_129 = arith.constant 5.000000e-01 : f32
    %387 = vector.broadcast %cst_129 : f32 to vector<2x128xf32>
    %388 = arith.addf %386, %387 : vector<2x128xf32>
    %389 = vector.extract_strided_slice %388 {offsets = [0, 32], sizes = [2, 32], strides = [1, 1]} : vector<2x128xf32> to vector<2x32xf32>
    %390 = arith.mulf %389, %347 : vector<2x32xf32>
    %391 = vector.extract_strided_slice %388 {offsets = [0, 0], sizes = [2, 32], strides = [1, 1]} : vector<2x128xf32> to vector<2x32xf32>
    %392 = vector.extract_strided_slice %384 {offsets = [0, 64], sizes = [2, 32], strides = [1, 1]} : vector<2x128xf32> to vector<2x32xf32>
    %393 = arith.mulf %391, %392 : vector<2x32xf32>
    %394 = arith.addf %390, %393 : vector<2x32xf32>
    %395 = vector.extract_strided_slice %388 {offsets = [0, 96], sizes = [2, 32], strides = [1, 1]} : vector<2x128xf32> to vector<2x32xf32>
    %396 = math.tanh %394 : vector<2x32xf32>
    %397 = arith.mulf %395, %396 : vector<2x32xf32>
    %398 = vector.shape_cast %397 : vector<2x32xf32> to vector<2x1x32xf32>
    %c0_130 = arith.constant 0 : index
    %c6_131 = arith.constant 6 : index
    %c0_132 = arith.constant 0 : index
    %399 = vector.load %arg4[%c0_130, %c6_131, %c0_132] : memref<2x8x44xf32, #tpu.memory_space<vmem>>, vector<2x1x32xf32>
    tpu.vector_store %arg4[%c0_130, %c6_131, %c0_132], %398 {strides = array<i32>} : memref<2x8x44xf32, #tpu.memory_space<vmem>>, vector<2x1x32xf32>,
    %c7_133 = arith.constant 7 : index
    %c0_134 = arith.constant 0 : index
    %c0_135 = arith.constant 0 : index
    %400 = vector.load %arg5[%c7_133, %c0_134, %c0_135] : memref<8x2x128xf32, #tpu.memory_space<vmem>>, vector<1x2x128xf32>
    %401 = vector.shape_cast %400 : vector<1x2x128xf32> to vector<2x128xf32>
    %402 = tpu.concatenate %397, %376 in 1 : vector<2x32xf32>, vector<2x32xf32> -> vector<2x64xf32>
    %403 = arith.truncf %402 : vector<2x64xf32> to vector<2x64xbf16>
    %cst_136 = arith.constant dense<0.000000e+00> : vector<2x128xf32>
    %404 = tpu.matmul %403, %67, %cst_136 {dimension_numbers = #tpu.dot_dimension_numbers<[1], [0], [0], [1], [0, 0, 1, 1], [], []>} : vector<2x64xbf16>, vector<64x128xbf16>, vector<2x128xf32> -> vector<2x128xf32>
    %405 = arith.addf %401, %404 : vector<2x128xf32>
    %406 = vector.broadcast %70 : vector<1x128xf32> to vector<2x128xf32>
    %407 = arith.addf %405, %406 : vector<2x128xf32>
    %408 = vector.broadcast %71 : vector<1x128xf32> to vector<2x128xf32>
    %409 = arith.mulf %407, %408 : vector<2x128xf32>
    %410 = math.tanh %409 : vector<2x128xf32>
    %cst_137 = arith.constant 5.000000e-01 : f32
    %411 = vector.broadcast %cst_137 : f32 to vector<2x128xf32>
    %412 = arith.mulf %411, %410 : vector<2x128xf32>
    %cst_138 = arith.constant 5.000000e-01 : f32
    %413 = vector.broadcast %cst_138 : f32 to vector<2x128xf32>
    %414 = arith.addf %412, %413 : vector<2x128xf32>
    %415 = vector.extract_strided_slice %414 {offsets = [0, 32], sizes = [2, 32], strides = [1, 1]} : vector<2x128xf32> to vector<2x32xf32>
    %416 = arith.mulf %415, %373 : vector<2x32xf32>
    %417 = vector.extract_strided_slice %414 {offsets = [0, 0], sizes = [2, 32], strides = [1, 1]} : vector<2x128xf32> to vector<2x32xf32>
    %418 = vector.extract_strided_slice %410 {offsets = [0, 64], sizes = [2, 32], strides = [1, 1]} : vector<2x128xf32> to vector<2x32xf32>
    %419 = arith.mulf %417, %418 : vector<2x32xf32>
    %420 = arith.addf %416, %419 : vector<2x32xf32>
    %421 = vector.extract_strided_slice %414 {offsets = [0, 96], sizes = [2, 32], strides = [1, 1]} : vector<2x128xf32> to vector<2x32xf32>
    %422 = math.tanh %420 : vector<2x32xf32>
    %423 = arith.mulf %421, %422 : vector<2x32xf32>
    %424 = tpu.concatenate %423, %397 in 1 : vector<2x32xf32>, vector<2x32xf32> -> vector<2x64xf32>
    %425 = arith.truncf %424 : vector<2x64xf32> to vector<2x64xbf16>
    %cst_139 = arith.constant dense<0.000000e+00> : vector<2x128xf32>
    %426 = tpu.matmul %425, %68, %cst_139 {dimension_numbers = #tpu.dot_dimension_numbers<[1], [0], [0], [1], [0, 0, 1, 1], [], []>} : vector<2x64xbf16>, vector<64x128xbf16>, vector<2x128xf32> -> vector<2x128xf32>
    %427 = vector.broadcast %69 : vector<1x128xf32> to vector<2x128xf32>
    %428 = arith.addf %426, %427 : vector<2x128xf32>
    %429 = vector.broadcast %71 : vector<1x128xf32> to vector<2x128xf32>
    %430 = arith.mulf %428, %429 : vector<2x128xf32>
    %431 = math.tanh %430 : vector<2x128xf32>
    %cst_140 = arith.constant 5.000000e-01 : f32
    %432 = vector.broadcast %cst_140 : f32 to vector<2x128xf32>
    %433 = arith.mulf %432, %431 : vector<2x128xf32>
    %cst_141 = arith.constant 5.000000e-01 : f32
    %434 = vector.broadcast %cst_141 : f32 to vector<2x128xf32>
    %435 = arith.addf %433, %434 : vector<2x128xf32>
    %436 = vector.extract_strided_slice %435 {offsets = [0, 32], sizes = [2, 32], strides = [1, 1]} : vector<2x128xf32> to vector<2x32xf32>
    %437 = arith.mulf %436, %394 : vector<2x32xf32>
    %438 = vector.extract_strided_slice %435 {offsets = [0, 0], sizes = [2, 32], strides = [1, 1]} : vector<2x128xf32> to vector<2x32xf32>
    %439 = vector.extract_strided_slice %431 {offsets = [0, 64], sizes = [2, 32], strides = [1, 1]} : vector<2x128xf32> to vector<2x32xf32>
    %440 = arith.mulf %438, %439 : vector<2x32xf32>
    %441 = arith.addf %437, %440 : vector<2x32xf32>
    %442 = vector.extract_strided_slice %435 {offsets = [0, 96], sizes = [2, 32], strides = [1, 1]} : vector<2x128xf32> to vector<2x32xf32>
    %443 = math.tanh %441 : vector<2x32xf32>
    %444 = arith.mulf %442, %443 : vector<2x32xf32>
    %445 = vector.shape_cast %444 : vector<2x32xf32> to vector<2x1x32xf32>
    %c0_142 = arith.constant 0 : index
    %c7_143 = arith.constant 7 : index
    %c0_144 = arith.constant 0 : index
    %446 = vector.load %arg4[%c0_142, %c7_143, %c0_144] : memref<2x8x44xf32, #tpu.memory_space<vmem>>, vector<2x1x32xf32>
    tpu.vector_store %arg4[%c0_142, %c7_143, %c0_144], %445 {strides = array<i32>} : memref<2x8x44xf32, #tpu.memory_space<vmem>>, vector<2x1x32xf32>,
    %c384 = arith.constant 384 : index
    %c0_145 = arith.constant 0 : index
    %447 = vector.load %arg2[%c384, %c0_145] : memref<416x128xbf16, #tpu.memory_space<vmem>>, vector<32x12xbf16>
    %c6_146 = arith.constant 6 : index
    %c0_147 = arith.constant 0 : index
    %448 = vector.load %arg3[%c6_146, %c0_147] : memref<8x128xf32, #tpu.memory_space<vmem>>, vector<1x12xf32>
    %c0_148 = arith.constant 0 : index
    %c0_149 = arith.constant 0 : index
    %c0_150 = arith.constant 0 : index
    %449 = vector.load %arg4[%c0_148, %c0_149, %c0_150] : memref<2x8x44xf32, #tpu.memory_space<vmem>>, vector<1x8x32xf32>
    %450 = vector.shape_cast %449 : vector<1x8x32xf32> to vector<8x32xf32>
    %451 = arith.truncf %450 : vector<8x32xf32> to vector<8x32xbf16>
    %cst_151 = arith.constant dense<0.000000e+00> : vector<8x12xf32>
    %452 = tpu.matmul %451, %447, %cst_151 {dimension_numbers = #tpu.dot_dimension_numbers<[1], [0], [0], [1], [0, 0, 1, 1], [], []>} : vector<8x32xbf16>, vector<32x12xbf16>, vector<8x12xf32> -> vector<8x12xf32>
    %453 = vector.broadcast %448 : vector<1x12xf32> to vector<8x12xf32>
    %454 = arith.addf %452, %453 : vector<8x12xf32>
    %c0_152 = arith.constant 0 : index
    %c0_153 = arith.constant 0 : index
    %c32 = arith.constant 32 : index
    %455 = vector.load %arg4[%c0_152, %c0_153, %c32] : memref<2x8x44xf32, #tpu.memory_space<vmem>>, vector<1x8x12xf32>
    %456 = vector.shape_cast %455 : vector<1x8x12xf32> to vector<8x12xf32>
    %457 = vector.shape_cast %454 : vector<8x12xf32> to vector<1x8x12xf32>
    tpu.vector_store %arg4[%c0_152, %c0_153, %c32], %457 {strides = array<i32>} : memref<2x8x44xf32, #tpu.memory_space<vmem>>, vector<1x8x12xf32>,
    %c1_154 = arith.constant 1 : index
    %c0_155 = arith.constant 0 : index
    %c0_156 = arith.constant 0 : index
    %458 = vector.load %arg4[%c1_154, %c0_155, %c0_156] : memref<2x8x44xf32, #tpu.memory_space<vmem>>, vector<1x8x32xf32>
    %459 = vector.shape_cast %458 : vector<1x8x32xf32> to vector<8x32xf32>
    %460 = arith.truncf %459 : vector<8x32xf32> to vector<8x32xbf16>
    %cst_157 = arith.constant dense<0.000000e+00> : vector<8x12xf32>
    %461 = tpu.matmul %460, %447, %cst_157 {dimension_numbers = #tpu.dot_dimension_numbers<[1], [0], [0], [1], [0, 0, 1, 1], [], []>} : vector<8x32xbf16>, vector<32x12xbf16>, vector<8x12xf32> -> vector<8x12xf32>
    %462 = vector.broadcast %448 : vector<1x12xf32> to vector<8x12xf32>
    %463 = arith.addf %461, %462 : vector<8x12xf32>
    %c1_158 = arith.constant 1 : index
    %c0_159 = arith.constant 0 : index
    %c32_160 = arith.constant 32 : index
    %464 = vector.load %arg4[%c1_158, %c0_159, %c32_160] : memref<2x8x44xf32, #tpu.memory_space<vmem>>, vector<1x8x12xf32>
    %465 = vector.shape_cast %464 : vector<1x8x12xf32> to vector<8x12xf32>
    %466 = vector.shape_cast %463 : vector<8x12xf32> to vector<1x8x12xf32>
    tpu.vector_store %arg4[%c1_158, %c0_159, %c32_160], %466 {strides = array<i32>} : memref<2x8x44xf32, #tpu.memory_space<vmem>>, vector<1x8x12xf32>,
    return
  }
}

</mosaic_0001>

<bundles_post_ra>
// kernel: motion_encoder_forward.1
= control target key start
LH: loop header
LB: loop body
LE: loop exit
PB: predicated region body
PF: predicated region fallthrough
CT: control target
= control target key end

     0   :  { %vm73_vm0 = vcmask 1043456   ;;  %v2589_v0 = vmov 0.0   ;;  %vm2590_vm1 = vmmov 0   ;;  %vm69_vm2 = vcmask 719872   ;;  %s2592_s6 = smov 96   ;;  %s2593_s7 = smov 12   ;;  %s3332_s2 = inlined_call_operand.vmem [shape: bf16[416,128], index: 2, kind: input, shape index: {}]   ;;  %s3333_s1 = inlined_call_operand.vmem [shape: f32[2,88], index: 1, kind: input, shape index: {}]   ;;  %s3334_s3 = inlined_call_operand.vmem [shape: f32[8,128], index: 3, kind: input, shape index: {}]   ;;  %s3335_s0 = inlined_call_operand.vmem [shape: f32[16,11], index: 0, kind: input, shape index: {}]   ;;  %s3336_s4 = inlined_call_operand.vmem [shape: f32[2,8,44], index: 4, kind: output, shape index: {}]  }
   0x1   :  { %2241 = vmatprep.subr.bf16.mxu0 %v2589_v0  ;;  %v2497_v1 = vld [vmem:[%s3332_s2 + $0x28] ss:$0 sps:$4 sm:$0xff]   ;;  %2253 = vmatprep.mubr.msk.bf16.mxu0 %vm2590_vm1, %v2589_v0  ;;  %v2498_v3 = vld [vmem:[%s3332_s2 + $0x20] sm:$0xff]   ;;  %v2499_v4 = vld [vmem:[%s3332_s2 + $0x18] sm:$0xff]   ;;  %vm140_vm3 = vcmask 261120   ;;  %vm223_vm4 = vcmask 523264  }
   0x2   :  { %2257 = vmatprep.subr.bf16.mxu1 %v2589_v0  ;;  %2261 = vmatprep.mubr.msk.bf16.mxu1 %vm2590_vm1, %v2589_v0  ;;  %v75_v2 = vsel %vm73_vm0, %v2497_v1, 0  ;;  %v2500_v5 = vld [vmem:[%s3332_s2 + $0x10] sm:$0xff]   ;;  %v2501_v6 = vld [vmem:[%s3332_s2 + $0x8] sm:$0xff]   ;;  %v2502_v7 = vld [vmem:[%s3332_s2] sm:$0xff]   ;;  %vm286_vm5 = vcmask 1044480   ;;  %vm287_vm6 = vcmask 1045504  }
   0x3   :  { %2242 = vmatpush3.bf16.msra.mxu0 %v75_v2  ;;  %v18_v8 = vld [vmem:[%s3333_s1] sm:$0x3]  ;;  %v2503_v10 = vld [vmem:[%s3332_s2 + $0x38] sm:$0xff]   ;;  %v2504_v11 = vld [vmem:[%s3332_s2 + $0x30] sm:$0xff]   ;;  %v2591_v33 = vmov 65535   ;;  %vm282_vm7 = vcmask 89088  }
   0x4   :  { %2243 = vmatprep.subr.bf16.mxu0 %v2589_v0  ;;  %v19_v9 = vpack.c.bf16 %v18_v8, %v18_v8  ;;  %2258 = vmatpush3.bf16.msra.mxu1 %v2503_v10  ;;  %v2081_v12 = vld [vmem:[%s3334_s3] ss:$0 sm:$0xff]  ;;  %v2505_v18 = vld [vmem:[%s3332_s2 + $0x58] sm:$0xff]   ;;  %v2506_v21 = vld [vmem:[%s3332_s2 + $0x50] sm:$0xff]   ;;  %v288_v34 = vsel %vm286_vm5, 4294967295, %v2591_v33  ;;  %vm380_vm8 = vcmask 97280  }
   0x5   :  { %2259 = vmatprep.subr.bf16.mxu1 %v2589_v0  ;;  %v2507_v22 = vld [vmem:[%s3332_s2 + $0x48] sm:$0xff]   ;;  %v2508_v23 = vld [vmem:[%s3332_s2 + $0x40] sm:$0xff]   ;;  %v2510_v37 = vld [vmem:[%s3332_s2 + $0x78] sm:$0x3f]   ;;  %v289_v38 = vsel %vm287_vm6, %v288_v34, 0  ;;  %vm400_vm9 = vcmask 359424  }
   0x6   :  { %v2089_v24 = vld [vmem:[%s3334_s3 + $0x1] ss:$0 sm:$0xff]  ;;  %v268_v36 = vld [vmem:[%s3335_s0 + $0x8] sm:$0xff]  ;;  %v405_v40 = vsel %vm287_vm6, %v2510_v37, 0  ;;  %v2511_v42 = vld [vmem:[%s3332_s2 + $0x70] sm:$0xff]   ;;  %s2595_s14 = smov 32  }
   0x7   :  { %2244 = vmatpush3.bf16.msra.mxu0 %v2498_v3  ;;  %v2509_v32 = vld [vmem:[%s3332_s2 + $0x60] sm:$0x3f]   ;;  %v2512_v43 = vld [vmem:[%s3332_s2 + $0x68] sm:$0xff]   ;;  %v2735_v62 = vld [vmem:[%s3334_s3 + $0x7] ss:$0 sm:$0xff]  ;;  %vm614_vm10 = vcmask 253952  }
   0x8   :  { %2245 = vmatprep.subr.bf16.mxu0 %v2589_v0  ;;  %2260 = vmatpush3.bf16.msra.mxu1 %v2504_v11  ;;  %v267_v35 = vld [vmem:[%s3335_s0] sm:$0xff]  ;;  %v291_v39 = vand.u32 %v2509_v32, %v289_v38  ;;  %vm2024_vm11 = vcmask 359680  }
   0x9   :  { %2265 = vmatprep.subr.bf16.mxu1 %v2589_v0  ;;  %v269_v41 = vpack.c.bf16 %v268_v36, %v267_v35  ;;  %v2093_v44 = vld [vmem:[%s3334_s3 + $0x2] ss:$0 sm:$0xff]  ;;  %v2099_v50 = vld [vmem:[%s3334_s3 + $0x3] ss:$0 sm:$0xff]  ;;  %v374_v57 = vld [vmem:[%s3333_s1] sm:$0x3] }
   0xa   :  { %s2594_s1 = smov 64  }
   0xb   :  { %2246 = vmatpush3.bf16.msra.mxu0 %v2499_v4 }
   0xc   :  { %2247 = vmatprep.subr.bf16.mxu0 %v2589_v0 }
   0xf   :  { %2248 = vmatpush3.bf16.msra.mxu0 %v2500_v5 }
  0x10   :  { %2249 = vmatprep.subr.bf16.mxu0 %v2589_v0 }
  0x13   :  { %2250 = vmatpush3.bf16.msra.mxu0 %v2501_v6 }
  0x14   :  { %2251 = vmatprep.subr.bf16.mxu0 %v2589_v0 }
  0x17   :  { %2252 = vmatpush3.bf16.msra.mxu0 %v2502_v7 }
  0x18   :  { %2277 = vmatprep.subr.bf16.mxu0 %v2589_v0 }
  0x1a   :  { %2254 = vmatmul.mubr.msk.bf16.vlgmr.msra.gmra.mxu0 %vm69_vm2, %v19_v9 }
  0x1b   :  { %2279 = vmatprep.mubr.msk.bf16.mxu0 %vm2590_vm1, %v2589_v0  ;;  %2278 = vmatpush3.bf16.msra.mxu0 %v291_v39 }
  0x1c   :  { %2293 = vmatprep.subr.bf16.mxu0 %v2589_v0 }
  0x22   :  { %2280 = vmatmul.mubr.msk.bf16.vlgmr.msra.gmra.mxu0 %vm282_vm7, %v269_v41  ;;  %v2803_v41 = vld [vmem:[%s3332_s2 + $0x98] sm:$0xff]  }
  0x23   :  { %2301 = vmatprep.mubr.msk.bf16.mxu0 %vm2590_vm1, %v2589_v0 }
  0xda   :  { %v111_v13 = vpop.f32.mrf.mxu0 }
  0xdb   :  { %v112_v14 = vadd.f32 %v2081_v12, %v111_v13 }
  0xdc   :  { %v2255_v15 = vpop.f32.mrf.mxu0 }
  0xdd   :  { %v117_v16 = vmax.f32 %v112_v14, 0.0  ;;  %v2746_v15 = vld [vmem:[%s3332_s2 + $0xb8] sm:$0xff]  }
  0xde   :  { %v114_v17 = vpop.f32.mrf.mxu0  ;;  %2294 = vmatpush3.bf16.msra.mxu0 %v2746_v15 }
  0xdf   :  { %v118_v19 = vpack.c.bf16 %v117_v16, %v117_v16  ;;  %v2752_v16 = vld [vmem:[%s3332_s2 + $0xb0] sm:$0xff]   ;;  %2295 = vmatprep.subr.bf16.mxu0 %v2589_v0 }
  0xe0   :  { %v2256_v20 = vpop.f32.mrf.mxu0 }
  0xe1   :  { %2262 = vmatmul.mubr.msk.bf16.vlgmr.msra.gmra.mxu1 %vm140_vm3, %v118_v19  ;;  %v2768_v19 = vld [vmem:[%s3332_s2 + $0xa0] sm:$0xff]  }
  0xe2   :  { %2266 = vmatpush3.bf16.msra.mxu1 %v2505_v18  ;;  %2273 = vmatprep.mubr.msk.bf16.mxu1 %vm2590_vm1, %v2589_v0  ;;  %v327_v51 = vpop.f32.mrf.mxu0  ;;  %v2759_v18 = vld [vmem:[%s3332_s2 + $0xa8] sm:$0xff]  }
  0xe3   :  { %2267 = vmatprep.subr.bf16.mxu1 %v2589_v0  ;;  %v328_v52 = vadd.f32 %v2099_v50, %v327_v51  ;;  %2296 = vmatpush3.bf16.msra.mxu0 %v2752_v16 }
  0xe4   :  { %v2281_v53 = vpop.f32.mrf.mxu0  ;;  %2297 = vmatprep.subr.bf16.mxu0 %v2589_v0 }
  0xe5   :  { %334 = vst [vmem:[#allocation2] ss:$4 sps:$4 sm:$0xff] %v328_v52   ;;  %v2849_v52 = vld [vmem:[%s3334_s3 + $0x4] ss:$0 sm:$0xff] }
  0xe6   :  { %2268 = vmatpush3.bf16.msra.mxu1 %v2506_v21  ;;  %v330_v54 = vpop.f32.mrf.mxu0 }
  0xe7   :  { %2269 = vmatprep.subr.bf16.mxu1 %v2589_v0  ;;  %v331_v55 = vadd.f32 %v2099_v50, %v330_v54  ;;  %2298 = vmatpush3.bf16.msra.mxu0 %v2759_v18 }
  0xe8   :  { %v2282_v56 = vpop.f32.mrf.mxu0  ;;  %2299 = vmatprep.subr.bf16.mxu0 %v2589_v0 }
  0xe9   :  { %342 = vst [vmem:[#allocation2 + $0x8] ss:$4 sps:$4 sm:$0xff] %v331_v55  }
  0xea   :  { %2270 = vmatpush3.bf16.msra.mxu1 %v2507_v22 }
  0xeb   :  { %2271 = vmatprep.subr.bf16.mxu1 %v2589_v0  ;;  %2300 = vmatpush3.bf16.msra.mxu0 %v2768_v19 }
  0xec   :  { %v375_v61 = vld [vmem:[#allocation2] sm:$0x3]  ;;  %2317 = vmatprep.subr.bf16.mxu0 %v2589_v0  ;;  %v617_v53 = vld [vmem:[#allocation2 + $0x2] sm:$0x3] }
  0xee   :  { %2272 = vmatpush3.bf16.msra.mxu1 %v2508_v23 }
  0xef   :  { %2283 = vmatprep.subr.bf16.mxu1 %v2589_v0 }
 0x1a1   :  { %v178_v25 = vpop.f32.mrf.mxu1 }
 0x1a2   :  { %v179_v26 = vadd.f32 %v2089_v24, %v178_v25  ;;  %v2791_v25 = vld [vmem:[%s3334_s3 + $0x5] ss:$0 sm:$0xff] }
 0x1a3   :  { %v2263_v27 = vpop.f32.mrf.mxu1 }
 0x1a4   :  { %v184_v28 = vmax.f32 %v179_v26, 0.0 }
 0x1a5   :  { %v181_v29 = vpop.f32.mrf.mxu1 }
 0x1a6   :  { %v185_v30 = vpack.c.bf16 %v184_v28, %v184_v28 }
 0x1a7   :  { %v2264_v31 = vpop.f32.mrf.mxu1 }
 0x1a8   :  { %2274 = vmatmul.mubr.msk.bf16.vlgmr.msra.gmra.mxu1 %vm223_vm4, %v185_v30 }
 0x1a9   :  { %2289 = vmatprep.mubr.msk.bf16.mxu1 %vm2590_vm1, %v2589_v0  ;;  %2284 = vmatpush3.bf16.msra.mxu1 %v405_v40 }
 0x1aa   :  { %2285 = vmatprep.subr.bf16.mxu1 %v2589_v0 }
 0x1ad   :  { %2286 = vmatpush3.bf16.msra.mxu1 %v2511_v42  ;;  %v2809_v42 = vld [vmem:[%s3332_s2 + $0x90] sm:$0xff]  }
 0x1ae   :  { %2287 = vmatprep.subr.bf16.mxu1 %v2589_v0 }
 0x1b1   :  { %2288 = vmatpush3.bf16.msra.mxu1 %v2512_v43  ;;  %v2816_v43 = vld [vmem:[%s3332_s2 + $0x88] sm:$0xff]  }
 0x1b2   :  { %2305 = vmatprep.subr.bf16.mxu1 %v2589_v0 }
 0x268   :  { %v261_v45 = vpop.f32.mrf.mxu1 }
 0x269   :  { %v2720_v46 = vadd.f32 %v2093_v44, %v261_v45  ;;  %v2826_v45 = vld [vmem:[%s3332_s2 + $0x80] sm:$0xff]  }
 0x26a   :  { %v2275_v47 = vpop.f32.mrf.mxu1 }
 0x26b   :  { %456 = vrot.lane.b32.xlu1 %v2720_v46, %s2592_s6  ;;  %377 = vrot.lane.b32.xlu0 %v2720_v46, %s2593_s7 }
 0x26c   :  { %v264_v48 = vpop.f32.mrf.mxu1 }
 0x26e   :  { %v2276_v49 = vpop.f32.mrf.mxu1 }
 0x2dd   :  { %v378_v58 = vpop.permute.xlu0 %377  ;;  %v457_v11 = vpop.permute.xlu1 %456 }
 0x2de   :  { %v381_v59 = vsel %vm380_vm8, %v374_v57, %v378_v58 }
 0x2df   :  { %v382_v60 = vpack.c.bf16 %v381_v59, %v381_v59 }
 0x2e1   :  { %2290 = vmatmul.mubr.msk.bf16.vlgmr.msra.gmra.mxu1 %vm400_vm9, %v382_v60 }
 0x2e2   :  { %2313 = vmatprep.mubr.msk.bf16.mxu1 %vm2590_vm1, %v2589_v0  ;;  %2306 = vmatpush3.bf16.msra.mxu1 %v2803_v41 }
 0x2e3   :  { %2307 = vmatprep.subr.bf16.mxu1 %v2589_v0 }
 0x2e6   :  { %2308 = vmatpush3.bf16.msra.mxu1 %v2809_v42 }
 0x2e7   :  { %2309 = vmatprep.subr.bf16.mxu1 %v2589_v0 }
 0x2ea   :  { %2310 = vmatpush3.bf16.msra.mxu1 %v2816_v43 }
 0x2eb   :  { %2311 = vmatprep.subr.bf16.mxu1 %v2589_v0 }
 0x2ee   :  { %2312 = vmatpush3.bf16.msra.mxu1 %v2826_v45 }
 0x2ef   :  { %2329 = vmatprep.subr.bf16.mxu1 %v2589_v0 }
 0x3a1   :  { %v441_v63 = vpop.f32.mrf.mxu1 }
 0x3a2   :  { %v447_v1 = vadd.f32 %v441_v63, %v375_v61 }
 0x3a3   :  { %v2291_v2 = vpop.f32.mrf.mxu1 }
 0x3a4   :  { %v452_v3 = vmul.f32 %v2735_v62, %v447_v1 }
 0x3a5   :  { %v444_v4 = vpop.f32.mrf.mxu1 }
 0x3a6   :  { %2523 = vtanh.f32 %v452_v3 }
 0x3a7   :  { %v2292_v5 = vpop.f32.mrf.mxu1 }
 0x3b3   :  { %v2524_v6 = vpop.eup %2523 }
 0x3b4   :  { %461 = vrot.lane.b32.xlu0 %v2524_v6, %s2594_s1  ;;  %v454_v7 = vmul.f32 0.5, %v2524_v6 }
 0x3b6   :  { %v455_v8 = vadd.f32 0.5, %v454_v7 }
 0x3b8   :  { %v459_v12 = vmul.f32 %v457_v11, %v455_v8 }
 0x426   :  { %v462_v9 = vpop.permute.xlu0 %461 }
 0x427   :  { %v464_v10 = vmul.f32 %v462_v9, %v455_v8 }
 0x429   :  { %466 = vrot.lane.b32.xlu1 %v464_v10, %s2595_s14 }
 0x49b   :  { %v467_v13 = vpop.permute.xlu1 %466 }
 0x49c   :  { %v2740_v14 = vadd.f32 %v467_v13, %v459_v12 }
 0x49e   :  { %2525 = vtanh.f32 %v2740_v14 }
 0x4ab   :  { %v2526_v17 = vpop.eup %2525 }
 0x4ac   :  { %472 = vrot.lane.b32.xlu0 %v2526_v17, %s2594_s1 }
 0x51e   :  { %v473_v20 = vpop.permute.xlu0 %472 }
 0x51f   :  { %v475_v21 = vmul.f32 %v473_v20, %v455_v8 }
 0x521   :  { %477 = vrot.lane.b32.xlu1 %v475_v21, %s2595_s14 }
 0x525   :  { %557 = vrot.lane.b32.xlu1 %v2720_v46, %s2594_s1 }
 0x593   :  { %v478_v22 = vpop.permute.xlu1 %477 }
 0x594   :  { %v480_v23 = vsel %vm140_vm3, %v478_v22, %v2720_v46 }
 0x595   :  { %v481_v24 = vpack.c.bf16 %v480_v23, %v480_v23 }
 0x597   :  { %2302 = vmatmul.mubr.msk.bf16.vlgmr.msra.gmra.mxu0 %vm223_vm4, %v481_v24  ;;  %v558_v37 = vpop.permute.xlu1 %557 }
 0x598   :  { %2318 = vmatpush3.bf16.msra.mxu0 %v2746_v15  ;;  %2325 = vmatprep.mubr.msk.bf16.mxu0 %vm2590_vm1, %v2589_v0 }
 0x599   :  { %2319 = vmatprep.subr.bf16.mxu0 %v2589_v0 }
 0x59c   :  { %2320 = vmatpush3.bf16.msra.mxu0 %v2752_v16 }
 0x59d   :  { %2321 = vmatprep.subr.bf16.mxu0 %v2589_v0 }
 0x5a0   :  { %2322 = vmatpush3.bf16.msra.mxu0 %v2759_v18 }
 0x5a1   :  { %2323 = vmatprep.subr.bf16.mxu0 %v2589_v0 }
 0x5a4   :  { %2324 = vmatpush3.bf16.msra.mxu0 %v2768_v19 }
 0x5a5   :  { %2341 = vmatprep.subr.bf16.mxu0 %v2589_v0 }
 0x657   :  { %v547_v26 = vpop.f32.mrf.mxu0 }
 0x658   :  { %v548_v27 = vadd.f32 %v2791_v25, %v547_v26 }
 0x659   :  { %v2303_v28 = vpop.f32.mrf.mxu0 }
 0x65a   :  { %v553_v29 = vmul.f32 %v2735_v62, %v548_v27 }
 0x65b   :  { %v550_v30 = vpop.f32.mrf.mxu0 }
 0x65c   :  { %2527 = vtanh.f32 %v553_v29 }
 0x65d   :  { %v2304_v31 = vpop.f32.mrf.mxu0 }
 0x669   :  { %v2528_v32 = vpop.eup %2527 }
 0x66a   :  { %562 = vrot.lane.b32.xlu0 %v2528_v32, %s2594_s1  ;;  %v555_v33 = vmul.f32 0.5, %v2528_v32 }
 0x66c   :  { %v556_v34 = vadd.f32 0.5, %v555_v33 }
 0x66e   :  { %v560_v38 = vmul.f32 %v558_v37, %v556_v34 }
 0x6dc   :  { %v563_v35 = vpop.permute.xlu0 %562 }
 0x6dd   :  { %v565_v36 = vmul.f32 %v563_v35, %v556_v34 }
 0x6df   :  { %567 = vrot.lane.b32.xlu0 %v565_v36, %s2595_s14 }
 0x751   :  { %v568_v39 = vpop.permute.xlu0 %567 }
 0x752   :  { %v2797_v40 = vadd.f32 %v568_v39, %v560_v38 }
 0x754   :  { %2529 = vtanh.f32 %v2797_v40 }
 0x761   :  { %v2530_v44 = vpop.eup %2529 }
 0x762   :  { %573 = vrot.lane.b32.xlu1 %v2530_v44, %s2594_s1 }
 0x766   :  { %621 = vrot.lane.b32.xlu1 %v475_v21, %s2594_s1 }
 0x7d4   :  { %v574_v46 = vpop.permute.xlu1 %573 }
 0x7d5   :  { %v2830_v47 = vmul.f32 %v574_v46, %v556_v34 }
 0x7d7   :  { %618 = vrot.lane.b32.xlu0 %v2830_v47, %s2595_s14 }
 0x7d8   :  { %v622_v48 = vpop.permute.xlu1 %621 }
 0x849   :  { %v619_v49 = vpop.permute.xlu0 %618 }
 0x84a   :  { %v624_v50 = vsel %vm140_vm3, %v619_v49, %v622_v48 }
 0x84b   :  { %v625_v51 = vpack.c.bf16 %v624_v50, %v624_v50 }
 0x84d   :  { %2314 = vmatmul.mubr.msk.bf16.vlgmr.msra.gmra.mxu1 %vm223_vm4, %v625_v51 }
 0x84e   :  { %2330 = vmatpush3.bf16.msra.mxu1 %v2803_v41  ;;  %2337 = vmatprep.mubr.msk.bf16.mxu1 %vm2590_vm1, %v2589_v0 }
 0x84f   :  { %2331 = vmatprep.subr.bf16.mxu1 %v2589_v0 }
 0x852   :  { %2332 = vmatpush3.bf16.msra.mxu1 %v2809_v42 }
 0x853   :  { %2333 = vmatprep.subr.bf16.mxu1 %v2589_v0 }
 0x856   :  { %2334 = vmatpush3.bf16.msra.mxu1 %v2816_v43 }
 0x857   :  { %2335 = vmatprep.subr.bf16.mxu1 %v2589_v0 }
 0x85a   :  { %2336 = vmatpush3.bf16.msra.mxu1 %v2826_v45 }
 0x85b   :  { %2353 = vmatprep.subr.bf16.mxu1 %v2589_v0 }
 0x90d   :  { %v687_v54 = vpop.f32.mrf.mxu1 }
 0x90e   :  { %v693_v55 = vadd.f32 %v687_v54, %v617_v53 }
 0x90f   :  { %v2315_v56 = vpop.f32.mrf.mxu1 }
 0x910   :  { %v698_v57 = vadd.f32 %v2849_v52, %v693_v55 }
 0x911   :  { %v690_v58 = vpop.f32.mrf.mxu1 }
 0x912   :  { %v699_v59 = vmul.f32 %v2735_v62, %v698_v57 }
 0x913   :  { %v2316_v60 = vpop.f32.mrf.mxu1 }
 0x914   :  { %2531 = vtanh.f32 %v699_v59 }
 0x921   :  { %v2532_v61 = vpop.eup %2531 }
 0x922   :  { %705 = vrot.lane.b32.xlu0 %v2532_v61, %s2594_s1  ;;  %v701_v63 = vmul.f32 0.5, %v2532_v61 }
 0x924   :  { %v702_v1 = vadd.f32 0.5, %v701_v63 }
 0x926   :  { %v703_v4 = vmul.f32 %v702_v1, %v2740_v14 }
 0x994   :  { %v706_v2 = vpop.permute.xlu0 %705 }
 0x995   :  { %v708_v3 = vmul.f32 %v706_v2, %v702_v1 }
 0x997   :  { %710 = vrot.lane.b32.xlu1 %v708_v3, %s2595_s14 }
 0xa09   :  { %v711_v5 = vpop.permute.xlu1 %710 }
 0xa0a   :  { %v2856_v6 = vadd.f32 %v711_v5, %v703_v4 }
 0xa0c   :  { %2533 = vtanh.f32 %v2856_v6 }
 0xa19   :  { %v2534_v7 = vpop.eup %2533 }
 0xa1a   :  { %716 = vrot.lane.b32.xlu0 %v2534_v7, %s2594_s1 }
 0xa1e   :  { %724 = vrot.lane.b32.xlu0 %v2830_v47, %s2594_s1 }
 0xa8c   :  { %v717_v8 = vpop.permute.xlu0 %716 }
 0xa8d   :  { %v719_v9 = vmul.f32 %v717_v8, %v702_v1 }
 0xa8f   :  { %721 = vrot.lane.b32.xlu1 %v719_v9, %s2595_s14 }
 0xa90   :  { %v725_v10 = vpop.permute.xlu0 %724 }
 0xb01   :  { %v722_v11 = vpop.permute.xlu1 %721 }
 0xb02   :  { %v727_v12 = vsel %vm140_vm3, %v722_v11, %v725_v10 }
 0xb03   :  { %v728_v13 = vpack.c.bf16 %v727_v12, %v727_v12 }
 0xb05   :  { %2326 = vmatmul.mubr.msk.bf16.vlgmr.msra.gmra.mxu0 %vm223_vm4, %v728_v13 }
 0xb06   :  { %2342 = vmatpush3.bf16.msra.mxu0 %v2746_v15  ;;  %2349 = vmatprep.mubr.msk.bf16.mxu0 %vm2590_vm1, %v2589_v0 }
 0xb07   :  { %2343 = vmatprep.subr.bf16.mxu0 %v2589_v0 }
 0xb0a   :  { %2344 = vmatpush3.bf16.msra.mxu0 %v2752_v16 }
 0xb0b   :  { %2345 = vmatprep.subr.bf16.mxu0 %v2589_v0 }
 0xb0e   :  { %2346 = vmatpush3.bf16.msra.mxu0 %v2759_v18 }
 0xb0f   :  { %2347 = vmatprep.subr.bf16.mxu0 %v2589_v0 }
 0xb12   :  { %2348 = vmatpush3.bf16.msra.mxu0 %v2768_v19 }
 0xb13   :  { %2365 = vmatprep.subr.bf16.mxu0 %v2589_v0 }
 0xbc5   :  { %v766_v14 = vpop.f32.mrf.mxu0 }
 0xbc6   :  { %v767_v17 = vadd.f32 %v2791_v25, %v766_v14 }
 0xbc7   :  { %v2327_v20 = vpop.f32.mrf.mxu0 }
 0xbc8   :  { %v772_v21 = vmul.f32 %v2735_v62, %v767_v17 }
 0xbc9   :  { %v769_v22 = vpop.f32.mrf.mxu0 }
 0xbca   :  { %2535 = vtanh.f32 %v772_v21 }
 0xbcb   :  { %v2328_v23 = vpop.f32.mrf.mxu0 }
 0xbd7   :  { %v2536_v24 = vpop.eup %2535 }
 0xbd8   :  { %778 = vrot.lane.b32.xlu1 %v2536_v24, %s2594_s1  ;;  %v774_v26 = vmul.f32 0.5, %v2536_v24 }
 0xbda   :  { %v775_v27 = vadd.f32 0.5, %v774_v26 }
 0xbdc   :  { %v776_v30 = vmul.f32 %v775_v27, %v2797_v40  ;;  %v832_v40 = vld [vmem:[#allocation2 + $0x4] sm:$0x3] }
 0xc4a   :  { %v779_v28 = vpop.permute.xlu1 %778 }
 0xc4b   :  { %v781_v29 = vmul.f32 %v779_v28, %v775_v27 }
 0xc4d   :  { %783 = vrot.lane.b32.xlu0 %v781_v29, %s2595_s14 }
 0xcbf   :  { %v784_v31 = vpop.permute.xlu0 %783 }
 0xcc0   :  { %v2880_v32 = vadd.f32 %v784_v31, %v776_v30 }
 0xcc2   :  { %2537 = vtanh.f32 %v2880_v32 }
 0xccf   :  { %v2538_v33 = vpop.eup %2537 }
 0xcd0   :  { %789 = vrot.lane.b32.xlu1 %v2538_v33, %s2594_s1  ;;  %v1019_v33 = vld [vmem:[#allocation2 + $0x6] sm:$0x3] }
 0xcd4   :  { %836 = vrot.lane.b32.xlu1 %v719_v9, %s2594_s1 }
 0xd42   :  { %v790_v34 = vpop.permute.xlu1 %789 }
 0xd43   :  { %v2885_v35 = vmul.f32 %v790_v34, %v775_v27 }
 0xd45   :  { %833 = vrot.lane.b32.xlu0 %v2885_v35, %s2595_s14 }
 0xd46   :  { %v837_v36 = vpop.permute.xlu1 %836 }
 0xdb7   :  { %v834_v37 = vpop.permute.xlu0 %833 }
 0xdb8   :  { %v839_v38 = vsel %vm140_vm3, %v834_v37, %v837_v36 }
 0xdb9   :  { %v840_v39 = vpack.c.bf16 %v839_v38, %v839_v38 }
 0xdbb   :  { %2338 = vmatmul.mubr.msk.bf16.vlgmr.msra.gmra.mxu1 %vm223_vm4, %v840_v39 }
 0xdbc   :  { %2354 = vmatpush3.bf16.msra.mxu1 %v2803_v41  ;;  %2361 = vmatprep.mubr.msk.bf16.mxu1 %vm2590_vm1, %v2589_v0 }
 0xdbd   :  { %2355 = vmatprep.subr.bf16.mxu1 %v2589_v0 }
 0xdc0   :  { %2356 = vmatpush3.bf16.msra.mxu1 %v2809_v42 }
 0xdc1   :  { %2357 = vmatprep.subr.bf16.mxu1 %v2589_v0 }
 0xdc4   :  { %2358 = vmatpush3.bf16.msra.mxu1 %v2816_v43 }
 0xdc5   :  { %2359 = vmatprep.subr.bf16.mxu1 %v2589_v0 }
 0xdc8   :  { %2360 = vmatpush3.bf16.msra.mxu1 %v2826_v45 }
 0xdc9   :  { %2377 = vmatprep.subr.bf16.mxu1 %v2589_v0 }
 0xe7b   :  { %v878_v44 = vpop.f32.mrf.mxu1 }
 0xe7c   :  { %v884_v46 = vadd.f32 %v878_v44, %v832_v40 }
 0xe7d   :  { %v2339_v48 = vpop.f32.mrf.mxu1 }
 0xe7e   :  { %v885_v49 = vadd.f32 %v2849_v52, %v884_v46 }
 0xe7f   :  { %v881_v50 = vpop.f32.mrf.mxu1 }
 0xe80   :  { %v886_v51 = vmul.f32 %v2735_v62, %v885_v49 }
 0xe81   :  { %v2340_v53 = vpop.f32.mrf.mxu1 }
 0xe82   :  { %2539 = vtanh.f32 %v886_v51 }
 0xe8f   :  { %v2540_v54 = vpop.eup %2539 }
 0xe90   :  { %892 = vrot.lane.b32.xlu0 %v2540_v54, %s2594_s1  ;;  %v888_v55 = vmul.f32 0.5, %v2540_v54 }
 0xe92   :  { %v889_v56 = vadd.f32 0.5, %v888_v55 }
 0xe94   :  { %v890_v59 = vmul.f32 %v889_v56, %v2856_v6 }
 0xf02   :  { %v893_v57 = vpop.permute.xlu0 %892 }
 0xf03   :  { %v895_v58 = vmul.f32 %v893_v57, %v889_v56 }
 0xf05   :  { %897 = vrot.lane.b32.xlu1 %v895_v58, %s2595_s14 }
 0xf77   :  { %v898_v60 = vpop.permute.xlu1 %897 }
 0xf78   :  { %v2906_v61 = vadd.f32 %v898_v60, %v890_v59 }
 0xf7a   :  { %2541 = vtanh.f32 %v2906_v61 }
 0xf87   :  { %v2542_v63 = vpop.eup %2541 }
 0xf88   :  { %903 = vrot.lane.b32.xlu0 %v2542_v63, %s2594_s1 }
 0xf8c   :  { %911 = vrot.lane.b32.xlu0 %v2885_v35, %s2594_s1 }
 0xffa   :  { %v904_v1 = vpop.permute.xlu0 %903 }
 0xffb   :  { %v906_v2 = vmul.f32 %v904_v1, %v889_v56 }
 0xffd   :  { %908 = vrot.lane.b32.xlu1 %v906_v2, %s2595_s14 }
 0xffe   :  { %v912_v3 = vpop.permute.xlu0 %911 }
0x106f   :  { %v909_v4 = vpop.permute.xlu1 %908 }
0x1070   :  { %v914_v5 = vsel %vm140_vm3, %v909_v4, %v912_v3 }
0x1071   :  { %v915_v6 = vpack.c.bf16 %v914_v5, %v914_v5 }
0x1073   :  { %2350 = vmatmul.mubr.msk.bf16.vlgmr.msra.gmra.mxu0 %vm223_vm4, %v915_v6 }
0x1074   :  { %2366 = vmatpush3.bf16.msra.mxu0 %v2746_v15  ;;  %2373 = vmatprep.mubr.msk.bf16.mxu0 %vm2590_vm1, %v2589_v0 }
0x1075   :  { %2367 = vmatprep.subr.bf16.mxu0 %v2589_v0 }
0x1078   :  { %2368 = vmatpush3.bf16.msra.mxu0 %v2752_v16 }
0x1079   :  { %2369 = vmatprep.subr.bf16.mxu0 %v2589_v0 }
0x107c   :  { %2370 = vmatpush3.bf16.msra.mxu0 %v2759_v18 }
0x107d   :  { %2371 = vmatprep.subr.bf16.mxu0 %v2589_v0 }
0x1080   :  { %2372 = vmatpush3.bf16.msra.mxu0 %v2768_v19 }
0x1081   :  { %2389 = vmatprep.subr.bf16.mxu0 %v2589_v0 }
0x1133   :  { %v953_v7 = vpop.f32.mrf.mxu0 }
0x1134   :  { %v954_v8 = vadd.f32 %v2791_v25, %v953_v7 }
0x1135   :  { %v2351_v9 = vpop.f32.mrf.mxu0 }
0x1136   :  { %v959_v10 = vmul.f32 %v2735_v62, %v954_v8 }
0x1137   :  { %v956_v11 = vpop.f32.mrf.mxu0 }
0x1138   :  { %2543 = vtanh.f32 %v959_v10 }
0x1139   :  { %v2352_v12 = vpop.f32.mrf.mxu0 }
0x1145   :  { %v2544_v13 = vpop.eup %2543 }
0x1146   :  { %965 = vrot.lane.b32.xlu1 %v2544_v13, %s2594_s1  ;;  %v961_v14 = vmul.f32 0.5, %v2544_v13 }
0x1148   :  { %v962_v17 = vadd.f32 0.5, %v961_v14 }
0x114a   :  { %v963_v22 = vmul.f32 %v962_v17, %v2880_v32 }
0x11b8   :  { %v966_v20 = vpop.permute.xlu1 %965 }
0x11b9   :  { %v968_v21 = vmul.f32 %v966_v20, %v962_v17 }
0x11bb   :  { %970 = vrot.lane.b32.xlu0 %v968_v21, %s2595_s14 }
0x122d   :  { %v971_v23 = vpop.permute.xlu0 %970 }
0x122e   :  { %v2930_v24 = vadd.f32 %v971_v23, %v963_v22 }
0x1230   :  { %2545 = vtanh.f32 %v2930_v24 }
0x123d   :  { %v2546_v26 = vpop.eup %2545 }
0x123e   :  { %976 = vrot.lane.b32.xlu1 %v2546_v26, %s2594_s1 }
0x1242   :  { %1023 = vrot.lane.b32.xlu1 %v906_v2, %s2594_s1 }
0x12b0   :  { %v977_v27 = vpop.permute.xlu1 %976 }
0x12b1   :  { %v2935_v28 = vmul.f32 %v977_v27, %v962_v17  ;;  %v1206_v27 = vld [vmem:[#allocation2 + $0x8] sm:$0x3] }
0x12b3   :  { %1020 = vrot.lane.b32.xlu0 %v2935_v28, %s2595_s14 }
0x12b4   :  { %v1024_v29 = vpop.permute.xlu1 %1023 }
0x1325   :  { %v1021_v30 = vpop.permute.xlu0 %1020 }
0x1326   :  { %v1026_v31 = vsel %vm140_vm3, %v1021_v30, %v1024_v29 }
0x1327   :  { %v1027_v32 = vpack.c.bf16 %v1026_v31, %v1026_v31 }
0x1329   :  { %2362 = vmatmul.mubr.msk.bf16.vlgmr.msra.gmra.mxu1 %vm223_vm4, %v1027_v32 }
0x132a   :  { %2378 = vmatpush3.bf16.msra.mxu1 %v2803_v41  ;;  %2385 = vmatprep.mubr.msk.bf16.mxu1 %vm2590_vm1, %v2589_v0 }
0x132b   :  { %2379 = vmatprep.subr.bf16.mxu1 %v2589_v0 }
0x132e   :  { %2380 = vmatpush3.bf16.msra.mxu1 %v2809_v42 }
0x132f   :  { %2381 = vmatprep.subr.bf16.mxu1 %v2589_v0 }
0x1332   :  { %2382 = vmatpush3.bf16.msra.mxu1 %v2816_v43 }
0x1333   :  { %2383 = vmatprep.subr.bf16.mxu1 %v2589_v0 }
0x1336   :  { %2384 = vmatpush3.bf16.msra.mxu1 %v2826_v45 }
0x1337   :  { %2401 = vmatprep.subr.bf16.mxu1 %v2589_v0 }
0x13e9   :  { %v1065_v34 = vpop.f32.mrf.mxu1 }
0x13ea   :  { %v1071_v36 = vadd.f32 %v1065_v34, %v1019_v33 }
0x13eb   :  { %v2363_v37 = vpop.f32.mrf.mxu1 }
0x13ec   :  { %v1072_v38 = vadd.f32 %v2849_v52, %v1071_v36 }
0x13ed   :  { %v1068_v39 = vpop.f32.mrf.mxu1 }
0x13ee   :  { %v1073_v40 = vmul.f32 %v2735_v62, %v1072_v38 }
0x13ef   :  { %v2364_v44 = vpop.f32.mrf.mxu1 }
0x13f0   :  { %2547 = vtanh.f32 %v1073_v40 }
0x13fd   :  { %v2548_v46 = vpop.eup %2547 }
0x13fe   :  { %1079 = vrot.lane.b32.xlu0 %v2548_v46, %s2594_s1  ;;  %v1075_v48 = vmul.f32 0.5, %v2548_v46 }
0x1400   :  { %v1076_v49 = vadd.f32 0.5, %v1075_v48 }
0x1402   :  { %v1077_v53 = vmul.f32 %v1076_v49, %v2906_v61 }
0x1470   :  { %v1080_v50 = vpop.permute.xlu0 %1079 }
0x1471   :  { %v1082_v51 = vmul.f32 %v1080_v50, %v1076_v49 }
0x1473   :  { %1084 = vrot.lane.b32.xlu1 %v1082_v51, %s2595_s14 }
0x14e5   :  { %v1085_v54 = vpop.permute.xlu1 %1084 }
0x14e6   :  { %v2956_v55 = vadd.f32 %v1085_v54, %v1077_v53 }
0x14e8   :  { %2549 = vtanh.f32 %v2956_v55 }
0x14f5   :  { %v2550_v56 = vpop.eup %2549 }
0x14f6   :  { %1090 = vrot.lane.b32.xlu0 %v2550_v56, %s2594_s1 }
0x14fa   :  { %1098 = vrot.lane.b32.xlu0 %v2935_v28, %s2594_s1 }
0x1568   :  { %v1091_v57 = vpop.permute.xlu0 %1090 }
0x1569   :  { %v1093_v58 = vmul.f32 %v1091_v57, %v1076_v49 }
0x156b   :  { %1095 = vrot.lane.b32.xlu1 %v1093_v58, %s2595_s14 }
0x156c   :  { %v1099_v59 = vpop.permute.xlu0 %1098 }
0x15dd   :  { %v1096_v60 = vpop.permute.xlu1 %1095 }
0x15de   :  { %v1101_v63 = vsel %vm140_vm3, %v1096_v60, %v1099_v59 }
0x15df   :  { %v1102_v61 = vpack.c.bf16 %v1101_v63, %v1101_v63 }
0x15e1   :  { %2374 = vmatmul.mubr.msk.bf16.vlgmr.msra.gmra.mxu0 %vm223_vm4, %v1102_v61 }
0x15e2   :  { %2390 = vmatpush3.bf16.msra.mxu0 %v2746_v15  ;;  %2397 = vmatprep.mubr.msk.bf16.mxu0 %vm2590_vm1, %v2589_v0 }
0x15e3   :  { %2391 = vmatprep.subr.bf16.mxu0 %v2589_v0 }
0x15e6   :  { %2392 = vmatpush3.bf16.msra.mxu0 %v2752_v16 }
0x15e7   :  { %2393 = vmatprep.subr.bf16.mxu0 %v2589_v0 }
0x15ea   :  { %2394 = vmatpush3.bf16.msra.mxu0 %v2759_v18 }
0x15eb   :  { %2395 = vmatprep.subr.bf16.mxu0 %v2589_v0 }
0x15ee   :  { %2396 = vmatpush3.bf16.msra.mxu0 %v2768_v19 }
0x15ef   :  { %2413 = vmatprep.subr.bf16.mxu0 %v2589_v0 }
0x16a1   :  { %v1140_v1 = vpop.f32.mrf.mxu0 }
0x16a2   :  { %v1141_v2 = vadd.f32 %v2791_v25, %v1140_v1 }
0x16a3   :  { %v2375_v3 = vpop.f32.mrf.mxu0 }
0x16a4   :  { %v1146_v4 = vmul.f32 %v2735_v62, %v1141_v2 }
0x16a5   :  { %v1143_v5 = vpop.f32.mrf.mxu0 }
0x16a6   :  { %2551 = vtanh.f32 %v1146_v4 }
0x16a7   :  { %v2376_v6 = vpop.f32.mrf.mxu0 }
0x16b3   :  { %v2552_v7 = vpop.eup %2551 }
0x16b4   :  { %1152 = vrot.lane.b32.xlu1 %v2552_v7, %s2594_s1  ;;  %v1148_v8 = vmul.f32 0.5, %v2552_v7 }
0x16b6   :  { %v1149_v9 = vadd.f32 0.5, %v1148_v8 }
0x16b8   :  { %v1150_v12 = vmul.f32 %v1149_v9, %v2930_v24 }
0x1726   :  { %v1153_v10 = vpop.permute.xlu1 %1152 }
0x1727   :  { %v1155_v11 = vmul.f32 %v1153_v10, %v1149_v9 }
0x1729   :  { %1157 = vrot.lane.b32.xlu0 %v1155_v11, %s2595_s14 }
0x179b   :  { %v1158_v13 = vpop.permute.xlu0 %1157 }
0x179c   :  { %v2980_v14 = vadd.f32 %v1158_v13, %v1150_v12 }
0x179e   :  { %2553 = vtanh.f32 %v2980_v14 }
0x17ab   :  { %v2554_v17 = vpop.eup %2553 }
0x17ac   :  { %1163 = vrot.lane.b32.xlu1 %v2554_v17, %s2594_s1 }
0x17b0   :  { %1210 = vrot.lane.b32.xlu1 %v1093_v58, %s2594_s1 }
0x181e   :  { %v1164_v20 = vpop.permute.xlu1 %1163 }
0x181f   :  { %v2985_v21 = vmul.f32 %v1164_v20, %v1149_v9 }
0x1821   :  { %1207 = vrot.lane.b32.xlu0 %v2985_v21, %s2595_s14 }
0x1822   :  { %v1211_v22 = vpop.permute.xlu1 %1210 }
0x1893   :  { %v1208_v23 = vpop.permute.xlu0 %1207 }
0x1894   :  { %v1213_v24 = vsel %vm140_vm3, %v1208_v23, %v1211_v22  ;;  %v1393_v22 = vld [vmem:[#allocation2 + $0xa] sm:$0x3] }
0x1895   :  { %v1214_v26 = vpack.c.bf16 %v1213_v24, %v1213_v24 }
0x1897   :  { %2386 = vmatmul.mubr.msk.bf16.vlgmr.msra.gmra.mxu1 %vm223_vm4, %v1214_v26 }
0x1898   :  { %2402 = vmatpush3.bf16.msra.mxu1 %v2803_v41  ;;  %2409 = vmatprep.mubr.msk.bf16.mxu1 %vm2590_vm1, %v2589_v0 }
0x1899   :  { %2403 = vmatprep.subr.bf16.mxu1 %v2589_v0 }
0x189c   :  { %2404 = vmatpush3.bf16.msra.mxu1 %v2809_v42 }
0x189d   :  { %2405 = vmatprep.subr.bf16.mxu1 %v2589_v0 }
0x18a0   :  { %2406 = vmatpush3.bf16.msra.mxu1 %v2816_v43 }
0x18a1   :  { %2407 = vmatprep.subr.bf16.mxu1 %v2589_v0 }
0x18a4   :  { %2408 = vmatpush3.bf16.msra.mxu1 %v2826_v45 }
0x18a5   :  { %2425 = vmatprep.subr.bf16.mxu1 %v2589_v0 }
0x1957   :  { %v1252_v29 = vpop.f32.mrf.mxu1 }
0x1958   :  { %v1258_v30 = vadd.f32 %v1252_v29, %v1206_v27 }
0x1959   :  { %v2387_v31 = vpop.f32.mrf.mxu1 }
0x195a   :  { %v1259_v32 = vadd.f32 %v2849_v52, %v1258_v30 }
0x195b   :  { %v1255_v33 = vpop.f32.mrf.mxu1 }
0x195c   :  { %v1260_v34 = vmul.f32 %v2735_v62, %v1259_v32 }
0x195d   :  { %v2388_v36 = vpop.f32.mrf.mxu1 }
0x195e   :  { %2555 = vtanh.f32 %v1260_v34 }
0x196b   :  { %v2556_v37 = vpop.eup %2555 }
0x196c   :  { %1266 = vrot.lane.b32.xlu0 %v2556_v37, %s2594_s1  ;;  %v1262_v38 = vmul.f32 0.5, %v2556_v37 }
0x196e   :  { %v1263_v39 = vadd.f32 0.5, %v1262_v38 }
0x1970   :  { %v1264_v46 = vmul.f32 %v1263_v39, %v2956_v55 }
0x19de   :  { %v1267_v40 = vpop.permute.xlu0 %1266 }
0x19df   :  { %v1269_v44 = vmul.f32 %v1267_v40, %v1263_v39 }
0x19e1   :  { %1271 = vrot.lane.b32.xlu1 %v1269_v44, %s2595_s14 }
0x1a53   :  { %v1272_v48 = vpop.permute.xlu1 %1271 }
0x1a54   :  { %v3006_v49 = vadd.f32 %v1272_v48, %v1264_v46 }
0x1a56   :  { %2557 = vtanh.f32 %v3006_v49 }
0x1a63   :  { %v2558_v50 = vpop.eup %2557 }
0x1a64   :  { %1277 = vrot.lane.b32.xlu0 %v2558_v50, %s2594_s1 }
0x1a68   :  { %1285 = vrot.lane.b32.xlu0 %v2985_v21, %s2594_s1 }
0x1ad6   :  { %v1278_v51 = vpop.permute.xlu0 %1277 }
0x1ad7   :  { %v1280_v53 = vmul.f32 %v1278_v51, %v1263_v39 }
0x1ad9   :  { %1282 = vrot.lane.b32.xlu1 %v1280_v53, %s2595_s14 }
0x1ada   :  { %v1286_v54 = vpop.permute.xlu0 %1285 }
0x1b4b   :  { %v1283_v56 = vpop.permute.xlu1 %1282 }
0x1b4c   :  { %v1288_v57 = vsel %vm140_vm3, %v1283_v56, %v1286_v54 }
0x1b4d   :  { %v1289_v55 = vpack.c.bf16 %v1288_v57, %v1288_v57 }
0x1b4f   :  { %2398 = vmatmul.mubr.msk.bf16.vlgmr.msra.gmra.mxu0 %vm223_vm4, %v1289_v55 }
0x1b50   :  { %2414 = vmatpush3.bf16.msra.mxu0 %v2746_v15  ;;  %2421 = vmatprep.mubr.msk.bf16.mxu0 %vm2590_vm1, %v2589_v0 }
0x1b51   :  { %2415 = vmatprep.subr.bf16.mxu0 %v2589_v0 }
0x1b54   :  { %2416 = vmatpush3.bf16.msra.mxu0 %v2752_v16 }
0x1b55   :  { %2417 = vmatprep.subr.bf16.mxu0 %v2589_v0 }
0x1b58   :  { %2418 = vmatpush3.bf16.msra.mxu0 %v2759_v18 }
0x1b59   :  { %2419 = vmatprep.subr.bf16.mxu0 %v2589_v0 }
0x1b5c   :  { %2420 = vmatpush3.bf16.msra.mxu0 %v2768_v19 }
0x1b5d   :  { %2437 = vmatprep.subr.bf16.mxu0 %v2589_v0 }
0x1c0f   :  { %v1327_v58 = vpop.f32.mrf.mxu0 }
0x1c10   :  { %v1328_v59 = vadd.f32 %v2791_v25, %v1327_v58 }
0x1c11   :  { %v2399_v60 = vpop.f32.mrf.mxu0 }
0x1c12   :  { %v1333_v63 = vmul.f32 %v2735_v62, %v1328_v59 }
0x1c13   :  { %v1330_v61 = vpop.f32.mrf.mxu0 }
0x1c14   :  { %2559 = vtanh.f32 %v1333_v63 }
0x1c15   :  { %v2400_v1 = vpop.f32.mrf.mxu0 }
0x1c21   :  { %v2560_v2 = vpop.eup %2559 }
0x1c22   :  { %1339 = vrot.lane.b32.xlu1 %v2560_v2, %s2594_s1  ;;  %v1335_v3 = vmul.f32 0.5, %v2560_v2 }
0x1c24   :  { %v1336_v4 = vadd.f32 0.5, %v1335_v3 }
0x1c26   :  { %v1337_v7 = vmul.f32 %v1336_v4, %v2980_v14 }
0x1c94   :  { %v1340_v5 = vpop.permute.xlu1 %1339 }
0x1c95   :  { %v1342_v6 = vmul.f32 %v1340_v5, %v1336_v4 }
0x1c97   :  { %1344 = vrot.lane.b32.xlu0 %v1342_v6, %s2595_s14 }
0x1d09   :  { %v1345_v8 = vpop.permute.xlu0 %1344 }
0x1d0a   :  { %v3030_v9 = vadd.f32 %v1345_v8, %v1337_v7 }
0x1d0c   :  { %2561 = vtanh.f32 %v3030_v9 }
0x1d19   :  { %v2562_v10 = vpop.eup %2561 }
0x1d1a   :  { %1350 = vrot.lane.b32.xlu1 %v2562_v10, %s2594_s1 }
0x1d1e   :  { %1397 = vrot.lane.b32.xlu1 %v1280_v53, %s2594_s1 }
0x1d8c   :  { %v1351_v11 = vpop.permute.xlu1 %1350 }
0x1d8d   :  { %v3035_v12 = vmul.f32 %v1351_v11, %v1336_v4 }
0x1d8f   :  { %1394 = vrot.lane.b32.xlu0 %v3035_v12, %s2595_s14 }
0x1d90   :  { %v1398_v13 = vpop.permute.xlu1 %1397 }
0x1e01   :  { %v1395_v17 = vpop.permute.xlu0 %1394 }
0x1e02   :  { %v1400_v14 = vsel %vm140_vm3, %v1395_v17, %v1398_v13  ;;  %v1580_v17 = vld [vmem:[#allocation2 + $0xc] sm:$0x3] }
0x1e03   :  { %v1401_v20 = vpack.c.bf16 %v1400_v14, %v1400_v14 }
0x1e05   :  { %2410 = vmatmul.mubr.msk.bf16.vlgmr.msra.gmra.mxu1 %vm223_vm4, %v1401_v20 }
0x1e06   :  { %2426 = vmatpush3.bf16.msra.mxu1 %v2803_v41  ;;  %2433 = vmatprep.mubr.msk.bf16.mxu1 %vm2590_vm1, %v2589_v0 }
0x1e07   :  { %2427 = vmatprep.subr.bf16.mxu1 %v2589_v0 }
0x1e0a   :  { %2428 = vmatpush3.bf16.msra.mxu1 %v2809_v42 }
0x1e0b   :  { %2429 = vmatprep.subr.bf16.mxu1 %v2589_v0 }
0x1e0e   :  { %2430 = vmatpush3.bf16.msra.mxu1 %v2816_v43 }
0x1e0f   :  { %2431 = vmatprep.subr.bf16.mxu1 %v2589_v0 }
0x1e12   :  { %2432 = vmatpush3.bf16.msra.mxu1 %v2826_v45 }
0x1e13   :  { %2449 = vmatprep.subr.bf16.mxu1 %v2589_v0 }
0x1ec5   :  { %v1439_v23 = vpop.f32.mrf.mxu1 }
0x1ec6   :  { %v1445_v24 = vadd.f32 %v1439_v23, %v1393_v22 }
0x1ec7   :  { %v2411_v26 = vpop.f32.mrf.mxu1 }
0x1ec8   :  { %v1446_v27 = vadd.f32 %v2849_v52, %v1445_v24 }
0x1ec9   :  { %v1442_v29 = vpop.f32.mrf.mxu1 }
0x1eca   :  { %v1447_v30 = vmul.f32 %v2735_v62, %v1446_v27 }
0x1ecb   :  { %v2412_v31 = vpop.f32.mrf.mxu1 }
0x1ecc   :  { %2563 = vtanh.f32 %v1447_v30 }
0x1ed9   :  { %v2564_v32 = vpop.eup %2563 }
0x1eda   :  { %1453 = vrot.lane.b32.xlu0 %v2564_v32, %s2594_s1  ;;  %v1449_v33 = vmul.f32 0.5, %v2564_v32 }
0x1edc   :  { %v1450_v34 = vadd.f32 0.5, %v1449_v33 }
0x1ede   :  { %v1451_v38 = vmul.f32 %v1450_v34, %v3006_v49 }
0x1f4c   :  { %v1454_v36 = vpop.permute.xlu0 %1453 }
0x1f4d   :  { %v1456_v37 = vmul.f32 %v1454_v36, %v1450_v34 }
0x1f4f   :  { %1458 = vrot.lane.b32.xlu1 %v1456_v37, %s2595_s14 }
0x1fc1   :  { %v1459_v39 = vpop.permute.xlu1 %1458 }
0x1fc2   :  { %v3056_v40 = vadd.f32 %v1459_v39, %v1451_v38 }
0x1fc4   :  { %2565 = vtanh.f32 %v3056_v40 }
0x1fd1   :  { %v2566_v44 = vpop.eup %2565 }
0x1fd2   :  { %1464 = vrot.lane.b32.xlu0 %v2566_v44, %s2594_s1 }
0x1fd6   :  { %1472 = vrot.lane.b32.xlu0 %v3035_v12, %s2594_s1 }
0x2044   :  { %v1465_v46 = vpop.permute.xlu0 %1464 }
0x2045   :  { %v1467_v48 = vmul.f32 %v1465_v46, %v1450_v34 }
0x2047   :  { %1469 = vrot.lane.b32.xlu1 %v1467_v48, %s2595_s14 }
0x2048   :  { %v1473_v50 = vpop.permute.xlu0 %1472 }
0x20b9   :  { %v1470_v51 = vpop.permute.xlu1 %1469 }
0x20ba   :  { %v1475_v53 = vsel %vm140_vm3, %v1470_v51, %v1473_v50 }
0x20bb   :  { %v1476_v49 = vpack.c.bf16 %v1475_v53, %v1475_v53 }
0x20bd   :  { %2422 = vmatmul.mubr.msk.bf16.vlgmr.msra.gmra.mxu0 %vm223_vm4, %v1476_v49 }
0x20be   :  { %2438 = vmatpush3.bf16.msra.mxu0 %v2746_v15  ;;  %2445 = vmatprep.mubr.msk.bf16.mxu0 %vm2590_vm1, %v2589_v0 }
0x20bf   :  { %2439 = vmatprep.subr.bf16.mxu0 %v2589_v0 }
0x20c2   :  { %2440 = vmatpush3.bf16.msra.mxu0 %v2752_v16 }
0x20c3   :  { %2441 = vmatprep.subr.bf16.mxu0 %v2589_v0 }
0x20c6   :  { %2442 = vmatpush3.bf16.msra.mxu0 %v2759_v18 }
0x20c7   :  { %2443 = vmatprep.subr.bf16.mxu0 %v2589_v0 }
0x20ca   :  { %2444 = vmatpush3.bf16.msra.mxu0 %v2768_v19 }
0x20cb   :  { %2461 = vmatprep.subr.bf16.mxu0 %v2589_v0 }
0x217d   :  { %v1514_v54 = vpop.f32.mrf.mxu0 }
0x217e   :  { %v1515_v56 = vadd.f32 %v2791_v25, %v1514_v54 }
0x217f   :  { %v2423_v57 = vpop.f32.mrf.mxu0 }
0x2180   :  { %v1520_v55 = vmul.f32 %v2735_v62, %v1515_v56 }
0x2181   :  { %v1517_v58 = vpop.f32.mrf.mxu0 }
0x2182   :  { %2567 = vtanh.f32 %v1520_v55 }
0x2183   :  { %v2424_v59 = vpop.f32.mrf.mxu0 }
0x218f   :  { %v2568_v60 = vpop.eup %2567 }
0x2190   :  { %1526 = vrot.lane.b32.xlu1 %v2568_v60, %s2594_s1  ;;  %v1522_v63 = vmul.f32 0.5, %v2568_v60 }
0x2192   :  { %v1523_v61 = vadd.f32 0.5, %v1522_v63 }
0x2194   :  { %v1524_v3 = vmul.f32 %v1523_v61, %v3030_v9 }
0x2202   :  { %v1527_v1 = vpop.permute.xlu1 %1526 }
0x2203   :  { %v1529_v2 = vmul.f32 %v1527_v1, %v1523_v61  ;;  %v1767_v1 = vld [vmem:[#allocation2 + $0xe] sm:$0x3] }
0x2205   :  { %1531 = vrot.lane.b32.xlu0 %v1529_v2, %s2595_s14 }
0x2277   :  { %v1532_v4 = vpop.permute.xlu0 %1531 }
0x2278   :  { %v3080_v5 = vadd.f32 %v1532_v4, %v1524_v3 }
0x227a   :  { %2569 = vtanh.f32 %v3080_v5 }
0x2287   :  { %v2570_v6 = vpop.eup %2569 }
0x2288   :  { %1537 = vrot.lane.b32.xlu1 %v2570_v6, %s2594_s1 }
0x228c   :  { %1584 = vrot.lane.b32.xlu1 %v1467_v48, %s2594_s1 }
0x22fa   :  { %v1538_v7 = vpop.permute.xlu1 %1537 }
0x22fb   :  { %v3085_v8 = vmul.f32 %v1538_v7, %v1523_v61 }
0x22fd   :  { %1581 = vrot.lane.b32.xlu0 %v3085_v8, %s2595_s14 }
0x22fe   :  { %v1585_v10 = vpop.permute.xlu1 %1584 }
0x236f   :  { %v1582_v11 = vpop.permute.xlu0 %1581 }
0x2370   :  { %v1587_v9 = vsel %vm140_vm3, %v1582_v11, %v1585_v10 }
0x2371   :  { %v1588_v13 = vpack.c.bf16 %v1587_v9, %v1587_v9 }
0x2373   :  { %2434 = vmatmul.mubr.msk.bf16.vlgmr.msra.gmra.mxu1 %vm223_vm4, %v1588_v13 }
0x2374   :  { %2450 = vmatpush3.bf16.msra.mxu1 %v2803_v41  ;;  %2457 = vmatprep.mubr.msk.bf16.mxu1 %vm2590_vm1, %v2589_v0 }
0x2375   :  { %2451 = vmatprep.subr.bf16.mxu1 %v2589_v0 }
0x2378   :  { %2452 = vmatpush3.bf16.msra.mxu1 %v2809_v42 }
0x2379   :  { %2453 = vmatprep.subr.bf16.mxu1 %v2589_v0 }
0x237c   :  { %2454 = vmatpush3.bf16.msra.mxu1 %v2816_v43 }
0x237d   :  { %2455 = vmatprep.subr.bf16.mxu1 %v2589_v0 }
0x2380   :  { %2456 = vmatpush3.bf16.msra.mxu1 %v2826_v45 }
0x2381   :  { %2473 = vmatprep.subr.bf16.mxu1 %v2589_v0 }
0x2433   :  { %v1626_v14 = vpop.f32.mrf.mxu1 }
0x2434   :  { %v1632_v41 = vadd.f32 %v1626_v14, %v1580_v17 }
0x2435   :  { %v2435_v20 = vpop.f32.mrf.mxu1 }
0x2436   :  { %v1633_v22 = vadd.f32 %v2849_v52, %v1632_v41 }
0x2437   :  { %v1629_v23 = vpop.f32.mrf.mxu1 }
0x2438   :  { %v1634_v24 = vmul.f32 %v2735_v62, %v1633_v22 }
0x2439   :  { %v2436_v42 = vpop.f32.mrf.mxu1 }
0x243a   :  { %2571 = vtanh.f32 %v1634_v24 }
0x2447   :  { %v2572_v26 = vpop.eup %2571 }
0x2448   :  { %1640 = vrot.lane.b32.xlu0 %v2572_v26, %s2594_s1  ;;  %v1636_v43 = vmul.f32 0.5, %v2572_v26 }
0x244a   :  { %v1637_v27 = vadd.f32 0.5, %v1636_v43 }
0x244c   :  { %v1638_v30 = vmul.f32 %v1637_v27, %v3056_v40 }
0x24ba   :  { %v1641_v29 = vpop.permute.xlu0 %1640 }
0x24bb   :  { %v1643_v45 = vmul.f32 %v1641_v29, %v1637_v27 }
0x24bd   :  { %1645 = vrot.lane.b32.xlu1 %v1643_v45, %s2595_s14  ;;  %v2588_v45 = vld [vmem:[%s3334_s3 + $0x5] ss:$0 sm:$0xff] }
0x252f   :  { %v1646_v31 = vpop.permute.xlu1 %1645 }
0x2530   :  { %v3106_v32 = vadd.f32 %v1646_v31, %v1638_v30 }
0x2532   :  { %2573 = vtanh.f32 %v3106_v32 }
0x253f   :  { %v2574_v33 = vpop.eup %2573 }
0x2540   :  { %1651 = vrot.lane.b32.xlu0 %v2574_v33, %s2594_s1 }
0x2544   :  { %1659 = vrot.lane.b32.xlu0 %v3085_v8, %s2594_s1 }
0x25b2   :  { %v1652_v62 = vpop.permute.xlu0 %1651 }
0x25b3   :  { %v1654_v34 = vmul.f32 %v1652_v62, %v1637_v27 }
0x25b5   :  { %1656 = vrot.lane.b32.xlu1 %v1654_v34, %s2595_s14 }
0x25b6   :  { %v1660_v36 = vpop.permute.xlu0 %1659 }
0x2627   :  { %v1657_v37 = vpop.permute.xlu1 %1656 }
0x2628   :  { %v1662_v38 = vsel %vm140_vm3, %v1657_v37, %v1660_v36  ;;  %v2596_v36 = vmov 1966171168  }
0x2629   :  { %v1663_v39 = vpack.c.bf16 %v1662_v38, %v1662_v38  ;;  %v579_v37 = vunpack.c.l.s4 %v2596_v36  ;;  %v581_v38 = vlaneseq }
0x262b   :  { %2446 = vmatmul.mubr.msk.bf16.vlgmr.msra.gmra.mxu0 %vm223_vm4, %v1663_v39  ;;  %v580_v39 = vunpack.c.0.s8 %v579_v37  ;;  %v2522_v37 = vld [vmem:[%s3332_s2 + $0xc0] sm:$0xff]  }
0x262c   :  { %2462 = vmatpush3.bf16.msra.mxu0 %v2746_v15  ;;  %2469 = vmatprep.mubr.msk.bf16.mxu0 %vm2590_vm1, %v2589_v0  ;;  %v3128_v15 = vld [vmem:[%s3334_s3 + $0x7] ss:$0 sm:$0xff] }
0x262d   :  { %2463 = vmatprep.subr.bf16.mxu0 %v2589_v0 }
0x2630   :  { %2464 = vmatpush3.bf16.msra.mxu0 %v2752_v16 }
0x2631   :  { %2465 = vmatprep.subr.bf16.mxu0 %v2589_v0 }
0x2634   :  { %2466 = vmatpush3.bf16.msra.mxu0 %v2759_v18 }
0x2635   :  { %2467 = vmatprep.subr.bf16.mxu0 %v2589_v0 }
0x2638   :  { %2468 = vmatpush3.bf16.msra.mxu0 %v2768_v19 }
0x26eb   :  { %v1701_v40 = vpop.f32.mrf.mxu0 }
0x26ec   :  { %v1702_v44 = vadd.f32 %v2791_v25, %v1701_v40  ;;  %v582_v40 = vshrl.u32 %v581_v38, 7 }
0x26ed   :  { %v2447_v46 = vpop.f32.mrf.mxu0 }
0x26ee   :  { %v1707_v48 = vmul.f32 %v3128_v15, %v1702_v44  ;;  %v3163_v44 = vsub.s32 %v580_v39, %v582_v40 }
0x26ef   :  { %v1704_v16 = vpop.f32.mrf.mxu0 }
0x26f0   :  { %2575 = vtanh.f32 %v1707_v48  ;;  %v584_v48 = vrot.slane %v2830_v47, %v3163_v44 }
0x26f1   :  { %v2448_v50 = vpop.f32.mrf.mxu0 }
0x26f2   :  { %v987_v50 = vrot.slane %v2935_v28, %v3163_v44 }
0x26f4   :  { %v995_v47 = vrot.slane %v987_v50, %v3163_v44 }
0x26fd   :  { %v2576_v51 = vpop.eup %2575 }
0x26fe   :  { %1713 = vrot.lane.b32.xlu1 %v2576_v51, %s2594_s1  ;;  %v1709_v18 = vmul.f32 0.5, %v2576_v51 }
0x2700   :  { %v1710_v53 = vadd.f32 0.5, %v1709_v18  ;;  %v592_v18 = vrot.slane %v584_v48, %v3163_v44 }
0x2702   :  { %v1711_v25 = vmul.f32 %v1710_v53, %v3080_v5 }
0x2770   :  { %v1714_v19 = vpop.permute.xlu1 %1713 }
0x2771   :  { %v1716_v49 = vmul.f32 %v1714_v19, %v1710_v53  ;;  %v1361_v19 = vrot.slane %v3035_v12, %v3163_v44 }
0x2773   :  { %1718 = vrot.lane.b32.xlu0 %v1716_v49, %s2595_s14 }
0x27e5   :  { %v1719_v54 = vpop.permute.xlu0 %1718 }
0x27e6   :  { %v3134_v56 = vadd.f32 %v1719_v54, %v1711_v25  ;;  %v1369_v54 = vrot.slane %v1361_v19, %v3163_v44 }
0x27e8   :  { %2577 = vtanh.f32 %v3134_v56 }
0x27f5   :  { %v2578_v57 = vpop.eup %2577 }
0x27f6   :  { %1724 = vrot.lane.b32.xlu1 %v2578_v57, %s2594_s1  ;;  %v585_v57 = vcombine.high %v584_v48, %v584_v48 }
0x27fa   :  { %1771 = vrot.lane.b32.xlu1 %v1654_v34, %s2594_s1 }
0x2868   :  { %v1725_v55 = vpop.permute.xlu1 %1724 }
0x2869   :  { %v3139_v58 = vmul.f32 %v1725_v55, %v1710_v53  ;;  %v3173_v53 = vsub.s32 0, %v582_v40 }
0x286b   :  { %1768 = vrot.lane.b32.xlu0 %v3139_v58, %s2595_s14  ;;  %v603_v49 = vrot.slane %v592_v18, %v3173_v53  ;;  %v1735_v28 = vrot.slane %v3139_v58, %v3163_v44  ;;  %v1006_v25 = vrot.slane %v995_v47, %v3173_v53  ;;  %v1380_v55 = vrot.slane %v1369_v54, %v3173_v53 }
0x286c   :  { %v1772_v59 = vpop.permute.xlu1 %1771 }
0x286d   :  { %v1743_v12 = vrot.slane %v1735_v28, %v3163_v44 }
0x28dd   :  { %v1769_v60 = vpop.permute.xlu0 %1768 }
0x28de   :  { %v1774_v63 = vsel %vm140_vm3, %v1769_v60, %v1772_v59  ;;  %v988_v59 = vcombine.high %v987_v50, %v987_v50  ;;  %v1754_v60 = vrot.slane %v1743_v12, %v3173_v53 }
0x28df   :  { %v1775_v61 = vpack.c.bf16 %v1774_v63, %v1774_v63  ;;  %v599_v63 = vrot.slane %v585_v57, %v3163_v44 }
0x28e1   :  { %2458 = vmatmul.mubr.msk.bf16.vlgmr.msra.gmra.mxu1 %vm223_vm4, %v1775_v61  ;;  %v607_v61 = vrot.slane %v599_v63, %v3173_v53 }
0x28e2   :  { %2477 = vmatprep.mubr.msk.bf16.mxu1 %vm2590_vm1, %v2589_v0 }
0x29a1   :  { %v1813_v2 = vpop.f32.mrf.mxu1 }
0x29a2   :  { %v1819_v3 = vadd.f32 %v1813_v2, %v1767_v1  ;;  %v1002_v1 = vrot.slane %v988_v59, %v3163_v44  ;;  %v1736_v2 = vcombine.high %v1735_v28, %v1735_v28 }
0x29a3   :  { %v2459_v4 = vpop.f32.mrf.mxu1 }
0x29a4   :  { %v1820_v5 = vadd.f32 %v2849_v52, %v1819_v3  ;;  %v1010_v3 = vrot.slane %v1002_v1, %v3173_v53 }
0x29a5   :  { %v1816_v6 = vpop.f32.mrf.mxu1 }
0x29a6   :  { %v1821_v7 = vmul.f32 %v3128_v15, %v1820_v5  ;;  %v1750_v6 = vrot.slane %v1736_v2, %v3163_v44 }
0x29a7   :  { %v2460_v10 = vpop.f32.mrf.mxu1 }
0x29a8   :  { %2579 = vtanh.f32 %v1821_v7  ;;  %v1758_v7 = vrot.slane %v1750_v6, %v3173_v53 }
0x29b5   :  { %v2580_v11 = vpop.eup %2579 }
0x29b6   :  { %1827 = vrot.lane.b32.xlu0 %v2580_v11, %s2594_s1  ;;  %v1823_v9 = vmul.f32 0.5, %v2580_v11 }
0x29b8   :  { %v1824_v13 = vadd.f32 0.5, %v1823_v9 }
0x29ba   :  { %v1825_v41 = vmul.f32 %v1824_v13, %v3106_v32 }
0x2a28   :  { %v1828_v17 = vpop.permute.xlu0 %1827 }
0x2a29   :  { %v1830_v14 = vmul.f32 %v1828_v17, %v1824_v13 }
0x2a2b   :  { %1832 = vrot.lane.b32.xlu1 %v1830_v14, %s2595_s14  ;;  %v800_v14 = vrot.slane %v2885_v35, %v3163_v44  ;;  %v1548_v35 = vrot.slane %v3085_v8, %v3163_v44 }
0x2a2d   :  { %v1549_v39 = vcombine.high %v1548_v35, %v1548_v35 }
0x2a9d   :  { %v1833_v20 = vpop.permute.xlu1 %1832 }
0x2a9e   :  { %v1835_v22 = vadd.f32 %v1833_v20, %v1825_v41  ;;  %v1174_v41 = vrot.slane %v2985_v21, %v3163_v44  ;;  %v808_v20 = vrot.slane %v800_v14, %v3163_v44  ;;  %v801_v21 = vcombine.high %v800_v14, %v800_v14 }
0x2aa0   :  { %2581 = vtanh.f32 %v1835_v22  ;;  %v1175_v8 = vcombine.high %v1174_v41, %v1174_v41 }
0x2aad   :  { %v2582_v52 = vpop.eup %2581 }
0x2aae   :  { %1838 = vrot.lane.b32.xlu0 %v2582_v52, %s2594_s1 }
0x2ab2   :  { %1846 = vrot.lane.b32.xlu0 %v3139_v58, %s2594_s1  ;;  %v1362_v58 = vcombine.high %v1361_v19, %v1361_v19 }
0x2ab4   :  { %v1376_v4 = vrot.slane %v1362_v58, %v3163_v44 }
0x2ab6   :  { %v1384_v5 = vrot.slane %v1376_v4, %v3173_v53 }
0x2b20   :  { %v1839_v23 = vpop.permute.xlu0 %1838 }
0x2b21   :  { %v1841_v24 = vmul.f32 %v1839_v23, %v1824_v13  ;;  %v819_v23 = vrot.slane %v808_v20, %v3173_v53 }
0x2b23   :  { %1843 = vrot.lane.b32.xlu1 %v1841_v24, %s2595_s14  ;;  %v1182_v24 = vrot.slane %v1174_v41, %v3163_v44 }
0x2b24   :  { %v1847_v42 = vpop.permute.xlu0 %1846 }
0x2b95   :  { %v1844_v26 = vpop.permute.xlu1 %1843 }
0x2b96   :  { %v1849_v43 = vsel %vm140_vm3, %v1844_v26, %v1847_v42  ;;  %v1193_v26 = vrot.slane %v1182_v24, %v3173_v53 }
0x2b97   :  { %v1850_v27 = vpack.c.bf16 %v1849_v43, %v1849_v43  ;;  %v1556_v43 = vrot.slane %v1548_v35, %v3163_v44 }
0x2b99   :  { %2470 = vmatmul.mubr.msk.bf16.vlgmr.msra.gmra.mxu0 %vm223_vm4, %v1850_v27 }
0x2c59   :  { %v1888_v29 = vpop.f32.mrf.mxu0 }
0x2c5a   :  { %v1889_v30 = vadd.f32 %v2588_v45, %v1888_v29  ;;  %v1567_v29 = vrot.slane %v1556_v43, %v3173_v53  ;;  %v815_v45 = vrot.slane %v801_v21, %v3163_v44 }
0x2c5b   :  { %v2471_v31 = vpop.f32.mrf.mxu0 }
0x2c5c   :  { %v1894_v32 = vmul.f32 %v3128_v15, %v1889_v30  ;;  %v823_v31 = vrot.slane %v815_v45, %v3173_v53 }
0x2c5d   :  { %v1891_v33 = vpop.f32.mrf.mxu0 }
0x2c5e   :  { %2583 = vtanh.f32 %v1894_v32  ;;  %v1189_v32 = vrot.slane %v1175_v8, %v3163_v44 }
0x2c5f   :  { %v2472_v62 = vpop.f32.mrf.mxu0 }
0x2c60   :  { %v1197_v62 = vrot.slane %v1189_v32, %v3173_v53 }
0x2c6b   :  { %v2584_v34 = vpop.eup %2583 }
0x2c6c   :  { %1900 = vrot.lane.b32.xlu1 %v2584_v34, %s2594_s1  ;;  %v1896_v46 = vmul.f32 0.5, %v2584_v34  ;;  %v2521_v34 = vld [vmem:[%s3332_s2 + $0xc8] sm:$0xff]  }
0x2c6d   :  { %2474 = vmatpush3.bf16.msra.mxu1 %v2521_v34 }
0x2c6e   :  { %v3167_v16 = vadd.f32 0.5, %v1896_v46  ;;  %2475 = vmatprep.subr.bf16.mxu1 %v2589_v0 }
0x2c70   :  { %v1898_v10 = vmul.f32 %v3167_v16, %v3134_v56 }
0x2c71   :  { %2476 = vmatpush3.bf16.msra.mxu1 %v2522_v37 }
0x2c72   :  { %2481 = vmatprep.subr.bf16.mxu1 %v2589_v0 }
0x2cde   :  { %v1901_v15 = vpop.permute.xlu1 %1900 }
0x2cdf   :  { %v1903_v51 = vmul.f32 %v1901_v15, %v3167_v16 }
0x2ce1   :  { %1905 = vrot.lane.b32.xlu0 %v1903_v51, %s2595_s14  ;;  %v1563_v51 = vrot.slane %v1549_v39, %v3163_v44 }
0x2ce3   :  { %v1571_v18 = vrot.slane %v1563_v51, %v3173_v53 }
0x2ce5   :  { %608 = vrot.lane.b32.xlu0 %v603_v49, %s2595_s14 }
0x2ce9   :  { %1011 = vrot.lane.b32.xlu0 %v1006_v25, %s2595_s14 }
0x2ced   :  { %1385 = vrot.lane.b32.xlu0 %v1380_v55, %s2595_s14 }
0x2cf1   :  { %1759 = vrot.lane.b32.xlu0 %v1754_v60, %s2595_s14  ;;  %v2132_v60 = vld [vmem:[%s3334_s3 + $0x6] ss:$0 sm:$0xff] }
0x2cf5   :  { %610 = vrot.lane.b32.xlu0 %v607_v61, %s2595_s14 }
0x2cf9   :  { %1013 = vrot.lane.b32.xlu0 %v1010_v3, %s2595_s14 }
0x2cfd   :  { %1387 = vrot.lane.b32.xlu0 %v1384_v5, %s2595_s14 }
0x2d01   :  { %1761 = vrot.lane.b32.xlu0 %v1758_v7, %s2595_s14 }
0x2d53   :  { %v1906_v11 = vpop.permute.xlu0 %1905 }
0x2d54   :  { %v1908_v9 = vadd.f32 %v1906_v11, %v1898_v10 }
0x2d56   :  { %2585 = vtanh.f32 %v1908_v9 }
0x2d57   :  { %v609_v13 = vpop.permute.xlu0 %608 }
0x2d58   :  { %615 = vst.msk [vmem:[%s3336_s4] sm:$0x1] %vm614_vm10, %v609_v13 }
0x2d5b   :  { %v1012_v17 = vpop.permute.xlu0 %1011 }
0x2d5c   :  { %1017 = vst.msk [vmem:[%s3336_s4 + $0x2] sm:$0x1] %vm614_vm10, %v1012_v17 }
0x2d5f   :  { %v1386_v56 = vpop.permute.xlu0 %1385 }
0x2d60   :  { %1391 = vst.msk [vmem:[%s3336_s4 + $0x4] sm:$0x1] %vm614_vm10, %v1386_v56 }
0x2d63   :  { %v2586_v22 = vpop.eup %2585  ;;  %v1760_v52 = vpop.permute.xlu0 %1759 }
0x2d64   :  { %1765 = vst.msk [vmem:[%s3336_s4 + $0x6] sm:$0x1] %vm614_vm10, %v1760_v52  ;;  %1911 = vrot.lane.b32.xlu1 %v2586_v22, %s2594_s1 }
0x2d67   :  { %v611_v42 = vpop.permute.xlu0 %610 }
0x2d68   :  { %616 = vst.msk [vmem:[%s3336_s4 + $0x8] sm:$0x1] %vm614_vm10, %v611_v42  ;;  %824 = vrot.lane.b32.xlu1 %v819_v23, %s2595_s14 }
0x2d6b   :  { %v1014_v27 = vpop.permute.xlu0 %1013 }
0x2d6c   :  { %1018 = vst.msk [vmem:[%s3336_s4 + $0xa] sm:$0x1] %vm614_vm10, %v1014_v27  ;;  %1198 = vrot.lane.b32.xlu1 %v1193_v26, %s2595_s14 }
0x2d6f   :  { %v1388_v30 = vpop.permute.xlu0 %1387 }
0x2d70   :  { %1392 = vst.msk [vmem:[%s3336_s4 + $0xc] sm:$0x1] %vm614_vm10, %v1388_v30  ;;  %1572 = vrot.lane.b32.xlu1 %v1567_v29, %s2595_s14 }
0x2d73   :  { %v1762_v33 = vpop.permute.xlu0 %1761 }
0x2d74   :  { %1766 = vst.msk [vmem:[%s3336_s4 + $0xe] sm:$0x1] %vm614_vm10, %v1762_v33  ;;  %826 = vrot.lane.b32.xlu1 %v823_v31, %s2595_s14 }
0x2d78   :  { %1200 = vrot.lane.b32.xlu1 %v1197_v62, %s2595_s14 }
0x2dd6   :  { %v1912_v36 = vpop.permute.xlu1 %1911 }
0x2dd7   :  { %v1914_v38 = vmul.f32 %v1912_v36, %v3167_v16 }
0x2dd9   :  { %v1922_v40 = vrot.slane %v1914_v38, %v3163_v44 }
0x2dda   :  { %v825_v46 = vpop.permute.xlu1 %824 }
0x2ddb   :  { %v1930_v48 = vrot.slane %v1922_v40, %v3163_v44  ;;  %830 = vst.msk [vmem:[%s3336_s4 + $0x1] sm:$0x1] %vm614_vm10, %v825_v46  ;;  %v1923_v15 = vcombine.high %v1922_v40, %v1922_v40 }
0x2ddd   :  { %v1941_v50 = vrot.slane %v1930_v48, %v3173_v53  ;;  %v1937_v19 = vrot.slane %v1923_v15, %v3163_v44 }
0x2dde   :  { %v1199_v16 = vpop.permute.xlu1 %1198 }
0x2ddf   :  { %1204 = vst.msk [vmem:[%s3336_s4 + $0x3] sm:$0x1] %vm614_vm10, %v1199_v16  ;;  %1946 = vrot.lane.b32.xlu1 %v1941_v50, %s2595_s14  ;;  %v1945_v47 = vrot.slane %v1937_v19, %v3173_v53 }
0x2de2   :  { %v1573_v49 = vpop.permute.xlu1 %1572 }
0x2de3   :  { %1578 = vst.msk [vmem:[%s3336_s4 + $0x5] sm:$0x1] %vm614_vm10, %v1573_v49  ;;  %1574 = vrot.lane.b32.xlu1 %v1571_v18, %s2595_s14 }
0x2de6   :  { %v827_v28 = vpop.permute.xlu1 %826 }
0x2de7   :  { %831 = vst.msk [vmem:[%s3336_s4 + $0x9] sm:$0x1] %vm614_vm10, %v827_v28  ;;  %1948 = vrot.lane.b32.xlu1 %v1945_v47, %s2595_s14 }
0x2dea   :  { %v1201_v25 = vpop.permute.xlu1 %1200 }
0x2deb   :  { %1205 = vst.msk [vmem:[%s3336_s4 + $0xb] sm:$0x1] %vm614_vm10, %v1201_v25 }
0x2e51   :  { %v1947_v44 = vpop.permute.xlu1 %1946 }
0x2e52   :  { %1952 = vst.msk [vmem:[%s3336_s4 + $0x7] sm:$0x1] %vm614_vm10, %v1947_v44 }
0x2e55   :  { %v1575_v53 = vpop.permute.xlu1 %1574 }
0x2e56   :  { %1579 = vst.msk [vmem:[%s3336_s4 + $0xd] sm:$0x1] %vm614_vm10, %v1575_v53 }
0x2e59   :  { %v1949_v54 = vpop.permute.xlu1 %1948  ;;  %v1959_v57 = vld [vmem:[%s3336_s4] sm:$0xff] }
0x2e5a   :  { %1953 = vst.msk [vmem:[%s3336_s4 + $0xf] sm:$0x1] %vm614_vm10, %v1949_v54  ;;  %v1960_v55 = vpack.c.bf16 %v1959_v57, %v1959_v57 }
0x2e5c   :  { %2478 = vmatmul.mubr.msk.bf16.vlgmr.msra.gmra.mxu1 %vm140_vm3, %v1960_v55 }
0x2e5d   :  { %2482 = vmatpush3.bf16.msra.mxu1 %v2521_v34  ;;  %2485 = vmatprep.mubr.msk.bf16.mxu1 %vm2590_vm1, %v2589_v0 }
0x2e5e   :  { %2483 = vmatprep.subr.bf16.mxu1 %v2589_v0 }
0x2e61   :  { %2484 = vmatpush3.bf16.msra.mxu1 %v2522_v37  ;;  %v2136_v12 = vld [vmem:[%s3336_s4 + $0x8] sm:$0xff] }
0x2e62   :  { %v2028_v59 = vpack.c.bf16 %v2136_v12, %v2136_v12 }
0x2e64   :  { %2486 = vmatmul.mubr.msk.bf16.vlgmr.msra.gmra.mxu1 %vm140_vm3, %v2028_v59 }
0x2f1c   :  { %v2014_v63 = vpop.f32.mrf.mxu1 }
0x2f1d   :  { %v2015_v58 = vadd.f32 %v2132_v60, %v2014_v63 }
0x2f1e   :  { %v2479_v61 = vpop.f32.mrf.mxu1 }
0x2f1f   :  { %2021 = vrot.lane.b32.xlu0 %v2015_v58, %s2595_s14 }
0x2f20   :  { %v2017_v1 = vpop.f32.mrf.mxu1 }
0x2f22   :  { %v2480_v2 = vpop.f32.mrf.mxu1 }
0x2f24   :  { %v2066_v0 = vpop.f32.mrf.mxu1 }
0x2f25   :  { %v2067_v3 = vadd.f32 %v2132_v60, %v2066_v0 }
0x2f26   :  { %v2487_v4 = vpop.f32.mrf.mxu1 }
0x2f27   :  { %2073 = vrot.lane.b32.xlu1 %v2067_v3, %s2595_s14 }
0x2f28   :  { %v2069_v5 = vpop.f32.mrf.mxu1 }
0x2f2a   :  { %v2488_v6 = vpop.f32.mrf.mxu1 }
0x2f91   :  { %v2022_v7 = vpop.permute.xlu0 %2021 }
0x2f92   :  { %2025 = vst.msk [vmem:[%s3336_s4] sm:$0xff] %vm2024_vm11, %v2022_v7 }
0x2f99   :  { %v2074_v10 = vpop.permute.xlu1 %2073 }
0x2f9a   :  { %2138 = vst.msk [vmem:[%s3336_s4 + $0x8] sm:$0xff] %vm2024_vm11, %v2074_v10 }

</bundles_post_ra>
